<compile_context>
chip_gen: v7x
topology: tpu7x:2x2x1
jax: 0.10.0
libtpu: 0.0.40
codegen_flags: <defaults>
</compile_context>

<pallas_src>
import functools

import jax
import jax.numpy as jnp
from jax.experimental import pallas as pl
from jax.experimental.pallas import tpu as pltpu


def _conv_block_kernel(x_ref, w1_ref, b1_ref, g1_ref, bt1_ref,
                       w2_ref, b2_ref, g2_ref, bt2_ref,
                       o_ref, pad1_ref, pad2_ref,
                       *, Hh, Wh, Cin, Cout, G, eps):
    f32 = jnp.float32
    S = Hh * Wh

    # ---------------- MaxPool2d(2, 2) -----------------------------------
    # x_ref block: (1, 2*Hh, Wh, 2*Cin); last dim packs (w-parity, channel).
    x = x_ref[0].astype(f32).reshape(Hh, 2, Wh, 2 * Cin)
    xh = jnp.maximum(x[:, 0], x[:, 1])                   # pool rows: (Hh, Wh, 2*Cin)
    xp = jnp.maximum(xh[..., :Cin], xh[..., Cin:])       # pool cols: (Hh, Wh, Cin)

    # ---------------- GroupNorm + ReLU on a (S, C) activation -----------
    def group_norm_relu(y, gamma, beta):
        c = y.shape[-1]
        cpg = c // G
        s1 = jnp.sum(y, axis=0, keepdims=True)           # (1, C)
        s2 = jnp.sum(y * y, axis=0, keepdims=True)       # (1, C)
        if cpg > 1:
            # Sum within each channel group and broadcast back per channel with
            # one tiny (1,C)@(C,C) mask matmul (avoids awkward 3-D reshapes).
            gi = jax.lax.broadcasted_iota(jnp.int32, (c, c), 0) // cpg
            gj = jax.lax.broadcasted_iota(jnp.int32, (c, c), 1) // cpg
            gmask = (gi == gj).astype(f32)
            s1 = jnp.dot(s1, gmask, preferred_element_type=f32)
            s2 = jnp.dot(s2, gmask, preferred_element_type=f32)
        inv_n = 1.0 / float(S * cpg)
        mean = s1 * inv_n
        var = s2 * inv_n - mean * mean
        inv = jax.lax.rsqrt(var + eps)
        return jnp.maximum((y - mean) * (inv * gamma) + beta, 0.0)

    # ---------------- fused 3x3 conv (pad=1) + GN + ReLU -----------------
    def conv3x3_gn_relu(t, pad_ref, w_ref, b_ref, gamma, beta):
        # t: (Hh, Wh, C) f32 activation -> (S, Cout) f32 after GN + ReLU.
        c = t.shape[-1]
        # Zero-padded copy held in VMEM scratch (no jnp.pad / HBM round trip).
        pad_ref[...] = jnp.zeros(pad_ref.shape, pad_ref.dtype)
        pad_ref[1:Hh + 1, 1:Wh + 1, :] = t
        # im2col: fold the 3 kw taps into the lane (channel) axis ...
        xw = jnp.concatenate(
            [pad_ref[:, kw:kw + Wh, :] for kw in range(3)], axis=-1)   # (Hh+2, Wh, 3c)
        # ... and the 3 kh taps with leading(H)-axis slices only.
        p = jnp.concatenate(
            [xw[kh:kh + Hh] for kh in range(3)], axis=-1)              # (Hh, Wh, 9c)
        # One MXU matmul with contraction 9*c, f32 accumulation, bias in epilogue.
        y = jnp.dot(p.reshape(S, 9 * c), w_ref[...].astype(f32),
                    preferred_element_type=f32) + b_ref[...].astype(f32)
        return group_norm_relu(y, gamma, beta)

    z1 = conv3x3_gn_relu(xp, pad1_ref, w1_ref, b1_ref,
                         g1_ref[...].astype(f32), bt1_ref[...].astype(f32))
    z2 = conv3x3_gn_relu(z1.reshape(Hh, Wh, Cout), pad2_ref, w2_ref, b2_ref,
                         g2_ref[...].astype(f32), bt2_ref[...].astype(f32))

    o_ref[0] = z2.astype(o_ref.dtype)


def conv_block_forward(x_nchw, w1, b1, gamma1, beta1, w2, b2, gamma2, beta2,
                       *, num_groups=32, eps=1e-5):
    """Forward pass of `conv_block` (PyTorch NCHW in / NCHW out)."""
    N, Cin, H, W = x_nchw.shape
    Cout = w1.shape[0]
    assert H % 2 == 0 and W % 2 == 0, "spatial dims must be even for 2x2 pooling"
    assert Cout % num_groups == 0, "GroupNorm requires num_groups | out_ch"
    Hh, Wh = H // 2, W // 2
    S = Hh * Wh

    # NCHW -> NHWC, then pack the W-parity into the channel (lane) axis:
    # (N, H, Wh, 2*Cin).  The reshape fuses into the transpose copy in XLA, so
    # there is exactly one relayout pass on the activation and no pad pass.
    x4 = jnp.transpose(x_nchw, (0, 2, 3, 1)).reshape(N, H, Wh, 2 * Cin)

    # (Cout, Cin, 3, 3) -> (3, 3, Cin, Cout) -> (9*Cin, Cout): row index is
    # (kh*3 + kw)*Cin + cin, matching the in-kernel im2col ordering.
    w1r = jnp.transpose(w1, (2, 3, 1, 0)).reshape(9 * Cin, Cout)
    w2r = jnp.transpose(w2, (2, 3, 1, 0)).reshape(9 * Cout, Cout)
    row = lambda v: v.reshape(1, Cout)

    kernel = functools.partial(_conv_block_kernel, Hh=Hh, Wh=Wh, Cin=Cin,
                               Cout=Cout, G=num_groups, eps=eps)
    vec_spec = pl.BlockSpec((1, Cout), lambda b: (0, 0))

    out = pl.pallas_call(
        kernel,
        out_shape=jax.ShapeDtypeStruct((N, S, Cout), x_nchw.dtype),
        grid_spec=pltpu.PrefetchScalarGridSpec(
            num_scalar_prefetch=0,
            grid=(N,),
            in_specs=[
                pl.BlockSpec((1, 2 * Hh, Wh, 2 * Cin), lambda b: (b, 0, 0, 0)),
                pl.BlockSpec((9 * Cin, Cout), lambda b: (0, 0)),
                vec_spec, vec_spec, vec_spec,
                pl.BlockSpec((9 * Cout, Cout), lambda b: (0, 0)),
                vec_spec, vec_spec, vec_spec,
            ],
            out_specs=pl.BlockSpec((1, S, Cout), lambda b: (b, 0, 0)),
            scratch_shapes=[
                pltpu.VMEM((Hh + 2, Wh + 2, Cin), jnp.float32),
                pltpu.VMEM((Hh + 2, Wh + 2, Cout), jnp.float32),
            ],
        ),
        compiler_params=pltpu.CompilerParams(
            dimension_semantics=("parallel",),
        ),
    )(x4, w1r, row(b1), row(gamma1), row(beta1),
      w2r, row(b2), row(gamma2), row(beta2))

    # (N, Hh*Wh, Cout) -> (N, Hh, Wh, Cout) -> NCHW
    return jnp.transpose(out.reshape(N, Hh, Wh, Cout), (0, 3, 1, 2))


if __name__ == "__main__":
    # Small shapes consistent with the module: GroupNorm(32) requires
    # out_ch % 32 == 0, so use in_ch=4, out_ch=32, batch=2, 16x16 spatial.
    N, Cin, Cout, H, W = 2, 4, 32, 16, 16
    GROUPS, EPS = 32, 1e-5

    key = jax.random.PRNGKey(0)
    ks = jax.random.split(key, 8)
    x = jax.random.normal(ks[0], (N, Cin, H, W), dtype=jnp.float32)

    def conv_init(k, cout, cin):
        bound = 1.0 / ((cin * 9) ** 0.5)   # nn.Conv2d default init range
        kw_, kb_ = jax.random.split(k)
        w = jax.random.uniform(kw_, (cout, cin, 3, 3), jnp.float32, -bound, bound)
        b = jax.random.uniform(kb_, (cout,), jnp.float32, -bound, bound)
        return w, b

    w1, b1 = conv_init(ks[1], Cout, Cin)
    w2, b2 = conv_init(ks[2], Cout, Cout)
    gamma1 = jax.random.uniform(ks[3], (Cout,), jnp.float32, 0.5, 1.5)
    beta1 = 0.1 * jax.random.normal(ks[4], (Cout,), dtype=jnp.float32)
    gamma2 = jax.random.uniform(ks[5], (Cout,), jnp.float32, 0.5, 1.5)
    beta2 = 0.1 * jax.random.normal(ks[6], (Cout,), dtype=jnp.float32)

    out = conv_block_forward(x, w1, b1, gamma1, beta1, w2, b2, gamma2, beta2,
                             num_groups=GROUPS, eps=EPS)
    out = jax.block_until_ready(out)

    # ---- pure-JAX reference (same semantics as the PyTorch module) ----------
    def ref_forward(t):
        y = jax.lax.reduce_window(t, -jnp.inf, jax.lax.max,
                                  (1, 1, 2, 2), (1, 1, 2, 2), "VALID")

        def conv(a, w, b):
            return jax.lax.conv_general_dilated(
                a, w, (1, 1), ((1, 1), (1, 1)),
                dimension_numbers=("NCHW", "OIHW", "NCHW"),
            ) + b[None, :, None, None]

        def gn(a, gamma, beta):
            n, c, h, wd = a.shape
            ag = a.reshape(n, GROUPS, c // GROUPS, h, wd)
            mean = ag.mean(axis=(2, 3, 4), keepdims=True)
            var = ag.var(axis=(2, 3, 4), keepdims=True)
            an = ((ag - mean) / jnp.sqrt(var + EPS)).reshape(n, c, h, wd)
            return an * gamma[None, :, None, None] + beta[None, :, None, None]

        y = jax.nn.relu(gn(conv(y, w1, b1), gamma1, beta1))
        y = jax.nn.relu(gn(conv(y, w2, b2), gamma2, beta2))
        return y

    ref = ref_forward(x)
    assert out.shape == (N, Cout, H // 2, W // 2), out.shape
    max_err = float(jnp.max(jnp.abs(out - ref)))
    assert jnp.allclose(out, ref, atol=2e-4, rtol=2e-3), f"max |err| = {max_err}"

    print("KERNEL_OK")
</pallas_src>

<mosaic_0001>
module attributes {stable_mosaic.version = 11 : i64} {
  func.func @_conv_block_kernel(%arg0: i32, %arg1: memref<1x16x8x8xf32, #tpu.memory_space<vmem>>, %arg2: memref<36x32xf32, #tpu.memory_space<vmem>>, %arg3: memref<1x32xf32, #tpu.memory_space<vmem>>, %arg4: memref<1x32xf32, #tpu.memory_space<vmem>>, %arg5: memref<1x32xf32, #tpu.memory_space<vmem>>, %arg6: memref<288x32xf32, #tpu.memory_space<vmem>>, %arg7: memref<1x32xf32, #tpu.memory_space<vmem>>, %arg8: memref<1x32xf32, #tpu.memory_space<vmem>>, %arg9: memref<1x32xf32, #tpu.memory_space<vmem>>, %arg10: memref<1x64x32xf32, #tpu.memory_space<vmem>>, %arg11: memref<10x10x4xf32, #tpu.memory_space<vmem>>, %arg12: memref<10x10x32xf32, #tpu.memory_space<vmem>>) attributes {dimension_semantics = [#tpu.dimension_semantics<parallel>], iteration_bounds = array<i64: 2>, scalar_prefetch = 0 : i64, scratch_operands = 2 : i64, tpu.core_type = #tpu.core_type<tc>, window_params = [{transform_indices = @transform_0, window_bounds = array<i64: 1, 16, 8, 8>}, {pipeline_mode = #tpu.pipeline_mode<synchronous>, transform_indices = @transform_1, window_bounds = array<i64: 36, 32>}, {pipeline_mode = #tpu.pipeline_mode<synchronous>, transform_indices = @transform_2, window_bounds = array<i64: 1, 32>}, {pipeline_mode = #tpu.pipeline_mode<synchronous>, transform_indices = @transform_3, window_bounds = array<i64: 1, 32>}, {pipeline_mode = #tpu.pipeline_mode<synchronous>, transform_indices = @transform_4, window_bounds = array<i64: 1, 32>}, {pipeline_mode = #tpu.pipeline_mode<synchronous>, transform_indices = @transform_5, window_bounds = array<i64: 288, 32>}, {pipeline_mode = #tpu.pipeline_mode<synchronous>, transform_indices = @transform_6, window_bounds = array<i64: 1, 32>}, {pipeline_mode = #tpu.pipeline_mode<synchronous>, transform_indices = @transform_7, window_bounds = array<i64: 1, 32>}, {pipeline_mode = #tpu.pipeline_mode<synchronous>, transform_indices = @transform_8, window_bounds = array<i64: 1, 32>}, {transform_indices = @transform_9, window_bounds = array<i64: 1, 64, 32>}]} {
    %c0 = arith.constant 0 : index
    %c0_0 = arith.constant 0 : index
    %c0_1 = arith.constant 0 : index
    %c0_2 = arith.constant 0 : index
    %0 = vector.load %arg1[%c0, %c0_0, %c0_1, %c0_2] : memref<1x16x8x8xf32, #tpu.memory_space<vmem>>, vector<1x16x8x8xf32>
    %1 = vector.shape_cast %0 : vector<1x16x8x8xf32> to vector<16x8x8xf32>
    %2 = vector.shape_cast %1 : vector<16x8x8xf32> to vector<8x2x8x8xf32>
    %3 = vector.extract_strided_slice %2 {offsets = [0, 0, 0, 0], sizes = [8, 1, 8, 8], strides = [1, 1, 1, 1]} : vector<8x2x8x8xf32> to vector<8x1x8x8xf32>
    %4 = vector.shape_cast %3 : vector<8x1x8x8xf32> to vector<8x8x8xf32>
    %5 = vector.extract_strided_slice %2 {offsets = [0, 1, 0, 0], sizes = [8, 1, 8, 8], strides = [1, 1, 1, 1]} : vector<8x2x8x8xf32> to vector<8x1x8x8xf32>
    %6 = vector.shape_cast %5 : vector<8x1x8x8xf32> to vector<8x8x8xf32>
    %7 = arith.maximumf %4, %6 : vector<8x8x8xf32>
    %8 = vector.extract_strided_slice %7 {offsets = [0, 0, 0], sizes = [8, 8, 4], strides = [1, 1, 1]} : vector<8x8x8xf32> to vector<8x8x4xf32>
    %9 = vector.extract_strided_slice %7 {offsets = [0, 0, 4], sizes = [8, 8, 4], strides = [1, 1, 1]} : vector<8x8x8xf32> to vector<8x8x4xf32>
    %10 = arith.maximumf %8, %9 : vector<8x8x4xf32>
    %c0_3 = arith.constant 0 : index
    %c0_4 = arith.constant 0 : index
    %11 = vector.load %arg4[%c0_3, %c0_4] : memref<1x32xf32, #tpu.memory_space<vmem>>, vector<1x32xf32>
    %c0_5 = arith.constant 0 : index
    %c0_6 = arith.constant 0 : index
    %12 = vector.load %arg5[%c0_5, %c0_6] : memref<1x32xf32, #tpu.memory_space<vmem>>, vector<1x32xf32>
    %cst = arith.constant 0.000000e+00 : f32
    %13 = vector.broadcast %cst : f32 to vector<10x10x4xf32>
    %c0_7 = arith.constant 0 : index
    %c0_8 = arith.constant 0 : index
    %c0_9 = arith.constant 0 : index
    %14 = vector.load %arg11[%c0_7, %c0_8, %c0_9] : memref<10x10x4xf32, #tpu.memory_space<vmem>>, vector<10x10x4xf32>
    tpu.vector_store %arg11[%c0_7, %c0_8, %c0_9], %13 {strides = array<i32>} : memref<10x10x4xf32, #tpu.memory_space<vmem>>, vector<10x10x4xf32>,
    %c1 = arith.constant 1 : index
    %c1_10 = arith.constant 1 : index
    %c0_11 = arith.constant 0 : index
    %15 = vector.load %arg11[%c1, %c1_10, %c0_11] : memref<10x10x4xf32, #tpu.memory_space<vmem>>, vector<8x8x4xf32>
    tpu.vector_store %arg11[%c1, %c1_10, %c0_11], %10 {strides = array<i32>} : memref<10x10x4xf32, #tpu.memory_space<vmem>>, vector<8x8x4xf32>,
    %c0_12 = arith.constant 0 : index
    %c0_13 = arith.constant 0 : index
    %c0_14 = arith.constant 0 : index
    %16 = vector.load %arg11[%c0_12, %c0_13, %c0_14] : memref<10x10x4xf32, #tpu.memory_space<vmem>>, vector<10x8x4xf32>
    %c0_15 = arith.constant 0 : index
    %c1_16 = arith.constant 1 : index
    %c0_17 = arith.constant 0 : index
    %17 = vector.load %arg11[%c0_15, %c1_16, %c0_17] : memref<10x10x4xf32, #tpu.memory_space<vmem>>, vector<10x8x4xf32>
    %c0_18 = arith.constant 0 : index
    %c2 = arith.constant 2 : index
    %c0_19 = arith.constant 0 : index
    %18 = vector.load %arg11[%c0_18, %c2, %c0_19] : memref<10x10x4xf32, #tpu.memory_space<vmem>>, vector<10x8x4xf32>
    %19 = tpu.concatenate %16, %17, %18 in 2 : vector<10x8x4xf32>, vector<10x8x4xf32>, vector<10x8x4xf32> -> vector<10x8x12xf32>
    %20 = vector.extract_strided_slice %19 {offsets = [0, 0, 0], sizes = [8, 8, 12], strides = [1, 1, 1]} : vector<10x8x12xf32> to vector<8x8x12xf32>
    %21 = vector.extract_strided_slice %19 {offsets = [1, 0, 0], sizes = [8, 8, 12], strides = [1, 1, 1]} : vector<10x8x12xf32> to vector<8x8x12xf32>
    %22 = vector.extract_strided_slice %19 {offsets = [2, 0, 0], sizes = [8, 8, 12], strides = [1, 1, 1]} : vector<10x8x12xf32> to vector<8x8x12xf32>
    %23 = tpu.concatenate %20, %21, %22 in 2 : vector<8x8x12xf32>, vector<8x8x12xf32>, vector<8x8x12xf32> -> vector<8x8x36xf32>
    %24 = vector.shape_cast %23 : vector<8x8x36xf32> to vector<64x36xf32>
    %c0_20 = arith.constant 0 : index
    %c0_21 = arith.constant 0 : index
    %25 = vector.load %arg2[%c0_20, %c0_21] : memref<36x32xf32, #tpu.memory_space<vmem>>, vector<36x32xf32>
    %cst_22 = arith.constant dense<0.000000e+00> : vector<64x32xf32>
    %26 = tpu.matmul %24, %25, %cst_22 {dimension_numbers = #tpu.dot_dimension_numbers<[1], [0], [0], [1], [0, 0, 1, 1], [], []>} : vector<64x36xf32>, vector<36x32xf32>, vector<64x32xf32> -> vector<64x32xf32>
    %c0_23 = arith.constant 0 : index
    %c0_24 = arith.constant 0 : index
    %27 = vector.load %arg3[%c0_23, %c0_24] : memref<1x32xf32, #tpu.memory_space<vmem>>, vector<1x32xf32>
    %28 = vector.broadcast %27 : vector<1x32xf32> to vector<64x32xf32>
    %29 = arith.addf %26, %28 : vector<64x32xf32>
    %cst_25 = arith.constant dense<0.000000e+00> : vector<32xf32>
    %30 = vector.multi_reduction <add>, %29, %cst_25 [0] : vector<64x32xf32> to vector<32xf32>
    %31 = vector.shape_cast %30 : vector<32xf32> to vector<1x32xf32>
    %32 = arith.mulf %29, %29 : vector<64x32xf32>
    %cst_26 = arith.constant dense<0.000000e+00> : vector<32xf32>
    %33 = vector.multi_reduction <add>, %32, %cst_26 [0] : vector<64x32xf32> to vector<32xf32>
    %34 = vector.shape_cast %33 : vector<32xf32> to vector<1x32xf32>
    %cst_27 = arith.constant 1.562500e-02 : f32
    %35 = vector.broadcast %cst_27 : f32 to vector<1x32xf32>
    %36 = arith.mulf %31, %35 : vector<1x32xf32>
    %cst_28 = arith.constant 1.562500e-02 : f32
    %37 = vector.broadcast %cst_28 : f32 to vector<1x32xf32>
    %38 = arith.mulf %34, %37 : vector<1x32xf32>
    %39 = arith.mulf %36, %36 : vector<1x32xf32>
    %40 = arith.subf %38, %39 : vector<1x32xf32>
    %cst_29 = arith.constant 9.99999974E-6 : f32
    %41 = vector.broadcast %cst_29 : f32 to vector<1x32xf32>
    %42 = arith.addf %40, %41 : vector<1x32xf32>
    %43 = math.rsqrt %42 : vector<1x32xf32>
    %44 = vector.broadcast %36 : vector<1x32xf32> to vector<64x32xf32>
    %45 = arith.subf %29, %44 : vector<64x32xf32>
    %46 = arith.mulf %43, %11 : vector<1x32xf32>
    %47 = vector.broadcast %46 : vector<1x32xf32> to vector<64x32xf32>
    %48 = arith.mulf %45, %47 : vector<64x32xf32>
    %49 = vector.broadcast %12 : vector<1x32xf32> to vector<64x32xf32>
    %50 = arith.addf %48, %49 : vector<64x32xf32>
    %cst_30 = arith.constant 0.000000e+00 : f32
    %51 = vector.broadcast %cst_30 : f32 to vector<64x32xf32>
    %52 = arith.maximumf %50, %51 : vector<64x32xf32>
    %53 = vector.shape_cast %52 : vector<64x32xf32> to vector<8x8x32xf32>
    %c0_31 = arith.constant 0 : index
    %c0_32 = arith.constant 0 : index
    %54 = vector.load %arg8[%c0_31, %c0_32] : memref<1x32xf32, #tpu.memory_space<vmem>>, vector<1x32xf32>
    %c0_33 = arith.constant 0 : index
    %c0_34 = arith.constant 0 : index
    %55 = vector.load %arg9[%c0_33, %c0_34] : memref<1x32xf32, #tpu.memory_space<vmem>>, vector<1x32xf32>
    %cst_35 = arith.constant 0.000000e+00 : f32
    %56 = vector.broadcast %cst_35 : f32 to vector<10x10x32xf32>
    %c0_36 = arith.constant 0 : index
    %c0_37 = arith.constant 0 : index
    %c0_38 = arith.constant 0 : index
    %57 = vector.load %arg12[%c0_36, %c0_37, %c0_38] : memref<10x10x32xf32, #tpu.memory_space<vmem>>, vector<10x10x32xf32>
    tpu.vector_store %arg12[%c0_36, %c0_37, %c0_38], %56 {strides = array<i32>} : memref<10x10x32xf32, #tpu.memory_space<vmem>>, vector<10x10x32xf32>,
    %c1_39 = arith.constant 1 : index
    %c1_40 = arith.constant 1 : index
    %c0_41 = arith.constant 0 : index
    %58 = vector.load %arg12[%c1_39, %c1_40, %c0_41] : memref<10x10x32xf32, #tpu.memory_space<vmem>>, vector<8x8x32xf32>
    tpu.vector_store %arg12[%c1_39, %c1_40, %c0_41], %53 {strides = array<i32>} : memref<10x10x32xf32, #tpu.memory_space<vmem>>, vector<8x8x32xf32>,
    %c0_42 = arith.constant 0 : index
    %c0_43 = arith.constant 0 : index
    %c0_44 = arith.constant 0 : index
    %59 = vector.load %arg12[%c0_42, %c0_43, %c0_44] : memref<10x10x32xf32, #tpu.memory_space<vmem>>, vector<10x8x32xf32>
    %c0_45 = arith.constant 0 : index
    %c1_46 = arith.constant 1 : index
    %c0_47 = arith.constant 0 : index
    %60 = vector.load %arg12[%c0_45, %c1_46, %c0_47] : memref<10x10x32xf32, #tpu.memory_space<vmem>>, vector<10x8x32xf32>
    %c0_48 = arith.constant 0 : index
    %c2_49 = arith.constant 2 : index
    %c0_50 = arith.constant 0 : index
    %61 = vector.load %arg12[%c0_48, %c2_49, %c0_50] : memref<10x10x32xf32, #tpu.memory_space<vmem>>, vector<10x8x32xf32>
    %62 = tpu.concatenate %59, %60, %61 in 2 : vector<10x8x32xf32>, vector<10x8x32xf32>, vector<10x8x32xf32> -> vector<10x8x96xf32>
    %63 = vector.extract_strided_slice %62 {offsets = [0, 0, 0], sizes = [8, 8, 96], strides = [1, 1, 1]} : vector<10x8x96xf32> to vector<8x8x96xf32>
    %64 = vector.extract_strided_slice %62 {offsets = [1, 0, 0], sizes = [8, 8, 96], strides = [1, 1, 1]} : vector<10x8x96xf32> to vector<8x8x96xf32>
    %65 = vector.extract_strided_slice %62 {offsets = [2, 0, 0], sizes = [8, 8, 96], strides = [1, 1, 1]} : vector<10x8x96xf32> to vector<8x8x96xf32>
    %66 = tpu.concatenate %63, %64, %65 in 2 : vector<8x8x96xf32>, vector<8x8x96xf32>, vector<8x8x96xf32> -> vector<8x8x288xf32>
    %67 = vector.shape_cast %66 : vector<8x8x288xf32> to vector<64x288xf32>
    %c0_51 = arith.constant 0 : index
    %c0_52 = arith.constant 0 : index
    %68 = vector.load %arg6[%c0_51, %c0_52] : memref<288x32xf32, #tpu.memory_space<vmem>>, vector<288x32xf32>
    %cst_53 = arith.constant dense<0.000000e+00> : vector<64x32xf32>
    %69 = tpu.matmul %67, %68, %cst_53 {dimension_numbers = #tpu.dot_dimension_numbers<[1], [0], [0], [1], [0, 0, 1, 1], [], []>} : vector<64x288xf32>, vector<288x32xf32>, vector<64x32xf32> -> vector<64x32xf32>
    %c0_54 = arith.constant 0 : index
    %c0_55 = arith.constant 0 : index
    %70 = vector.load %arg7[%c0_54, %c0_55] : memref<1x32xf32, #tpu.memory_space<vmem>>, vector<1x32xf32>
    %71 = vector.broadcast %70 : vector<1x32xf32> to vector<64x32xf32>
    %72 = arith.addf %69, %71 : vector<64x32xf32>
    %cst_56 = arith.constant dense<0.000000e+00> : vector<32xf32>
    %73 = vector.multi_reduction <add>, %72, %cst_56 [0] : vector<64x32xf32> to vector<32xf32>
    %74 = vector.shape_cast %73 : vector<32xf32> to vector<1x32xf32>
    %75 = arith.mulf %72, %72 : vector<64x32xf32>
    %cst_57 = arith.constant dense<0.000000e+00> : vector<32xf32>
    %76 = vector.multi_reduction <add>, %75, %cst_57 [0] : vector<64x32xf32> to vector<32xf32>
    %77 = vector.shape_cast %76 : vector<32xf32> to vector<1x32xf32>
    %cst_58 = arith.constant 1.562500e-02 : f32
    %78 = vector.broadcast %cst_58 : f32 to vector<1x32xf32>
    %79 = arith.mulf %74, %78 : vector<1x32xf32>
    %cst_59 = arith.constant 1.562500e-02 : f32
    %80 = vector.broadcast %cst_59 : f32 to vector<1x32xf32>
    %81 = arith.mulf %77, %80 : vector<1x32xf32>
    %82 = arith.mulf %79, %79 : vector<1x32xf32>
    %83 = arith.subf %81, %82 : vector<1x32xf32>
    %cst_60 = arith.constant 9.99999974E-6 : f32
    %84 = vector.broadcast %cst_60 : f32 to vector<1x32xf32>
    %85 = arith.addf %83, %84 : vector<1x32xf32>
    %86 = math.rsqrt %85 : vector<1x32xf32>
    %87 = vector.broadcast %79 : vector<1x32xf32> to vector<64x32xf32>
    %88 = arith.subf %72, %87 : vector<64x32xf32>
    %89 = arith.mulf %86, %54 : vector<1x32xf32>
    %90 = vector.broadcast %89 : vector<1x32xf32> to vector<64x32xf32>
    %91 = arith.mulf %88, %90 : vector<64x32xf32>
    %92 = vector.broadcast %55 : vector<1x32xf32> to vector<64x32xf32>
    %93 = arith.addf %91, %92 : vector<64x32xf32>
    %cst_61 = arith.constant 0.000000e+00 : f32
    %94 = vector.broadcast %cst_61 : f32 to vector<64x32xf32>
    %95 = arith.maximumf %93, %94 : vector<64x32xf32>
    %c0_62 = arith.constant 0 : index
    %c0_63 = arith.constant 0 : index
    %c0_64 = arith.constant 0 : index
    %96 = vector.load %arg10[%c0_62, %c0_63, %c0_64] : memref<1x64x32xf32, #tpu.memory_space<vmem>>, vector<1x64x32xf32>
    %97 = vector.shape_cast %96 : vector<1x64x32xf32> to vector<64x32xf32>
    %98 = vector.shape_cast %95 : vector<64x32xf32> to vector<1x64x32xf32>
    tpu.vector_store %arg10[%c0_62, %c0_63, %c0_64], %98 {strides = array<i32>} : memref<1x64x32xf32, #tpu.memory_space<vmem>>, vector<1x64x32xf32>,
    return
  }
  func.func @transform_0(%arg0: i32) -> (i32, i32, i32, i32) {
    %c0_i32 = arith.constant 0 : i32
    %c0_i32_0 = arith.constant 0 : i32
    %c0_i32_1 = arith.constant 0 : i32
    %c0_i32_2 = arith.constant 0 : i32
    return %arg0, %c0_i32, %c0_i32_0, %c0_i32_1 : i32, i32, i32, i32
  }
  func.func @transform_1(%arg0: i32) -> (i32, i32) {
    %c0_i32 = arith.constant 0 : i32
    %c0_i32_0 = arith.constant 0 : i32
    %c0_i32_1 = arith.constant 0 : i32
    return %c0_i32, %c0_i32_0 : i32, i32
  }
  func.func @transform_2(%arg0: i32) -> (i32, i32) {
    %c0_i32 = arith.constant 0 : i32
    %c0_i32_0 = arith.constant 0 : i32
    %c0_i32_1 = arith.constant 0 : i32
    return %c0_i32, %c0_i32_0 : i32, i32
  }
  func.func @transform_3(%arg0: i32) -> (i32, i32) {
    %c0_i32 = arith.constant 0 : i32
    %c0_i32_0 = arith.constant 0 : i32
    %c0_i32_1 = arith.constant 0 : i32
    return %c0_i32, %c0_i32_0 : i32, i32
  }
  func.func @transform_4(%arg0: i32) -> (i32, i32) {
    %c0_i32 = arith.constant 0 : i32
    %c0_i32_0 = arith.constant 0 : i32
    %c0_i32_1 = arith.constant 0 : i32
    return %c0_i32, %c0_i32_0 : i32, i32
  }
  func.func @transform_5(%arg0: i32) -> (i32, i32) {
    %c0_i32 = arith.constant 0 : i32
    %c0_i32_0 = arith.constant 0 : i32
    %c0_i32_1 = arith.constant 0 : i32
    return %c0_i32, %c0_i32_0 : i32, i32
  }
  func.func @transform_6(%arg0: i32) -> (i32, i32) {
    %c0_i32 = arith.constant 0 : i32
    %c0_i32_0 = arith.constant 0 : i32
    %c0_i32_1 = arith.constant 0 : i32
    return %c0_i32, %c0_i32_0 : i32, i32
  }
  func.func @transform_7(%arg0: i32) -> (i32, i32) {
    %c0_i32 = arith.constant 0 : i32
    %c0_i32_0 = arith.constant 0 : i32
    %c0_i32_1 = arith.constant 0 : i32
    return %c0_i32, %c0_i32_0 : i32, i32
  }
  func.func @transform_8(%arg0: i32) -> (i32, i32) {
    %c0_i32 = arith.constant 0 : i32
    %c0_i32_0 = arith.constant 0 : i32
    %c0_i32_1 = arith.constant 0 : i32
    return %c0_i32, %c0_i32_0 : i32, i32
  }
  func.func @transform_9(%arg0: i32) -> (i32, i32, i32) {
    %c0_i32 = arith.constant 0 : i32
    %c0_i32_0 = arith.constant 0 : i32
    %c0_i32_1 = arith.constant 0 : i32
    return %arg0, %c0_i32, %c0_i32_0 : i32, i32, i32
  }
}

</mosaic_0001>

<bundles_post_ra>
// kernel: tpu_custom_call.1
= control target key start
LH: loop header
LB: loop body
LE: loop exit
PB: predicated region body
PF: predicated region fallthrough
CT: control target
= control target key end

     0   :  { %s1843_s30 = smov 0   ;;  %s2447_s0 = inlined_call_operand.vmem [shape: f32[2,16,8,8], index: 0, kind: input, shape index: {}]   ;;  %s2448_s1 = inlined_call_operand.vmem [shape: f32[36,32], index: 1, kind: input, shape index: {}]   ;;  %s2449_s2 = inlined_call_operand.vmem [shape: f32[1,32], index: 2, kind: input, shape index: {}]   ;;  %s2450_s3 = inlined_call_operand.vmem [shape: f32[1,32], index: 3, kind: input, shape index: {}]   ;;  %s2451_s4 = inlined_call_operand.vmem [shape: f32[1,32], index: 4, kind: input, shape index: {}]   ;;  %s2452_s5 = inlined_call_operand.vmem [shape: f32[288,32], index: 5, kind: input, shape index: {}]   ;;  %s2453_s6 = inlined_call_operand.vmem [shape: f32[1,32], index: 6, kind: input, shape index: {}]   ;;  %s2454_s7 = inlined_call_operand.vmem [shape: f32[1,32], index: 7, kind: input, shape index: {}]   ;;  %s2455_s8 = inlined_call_operand.vmem [shape: f32[1,32], index: 8, kind: input, shape index: {}]   ;;  %s2456_s9 = inlined_call_operand.vmem [shape: f32[2,64,32], index: 9, kind: output, shape index: {}]  }
   0x1 LB: > { %s1550_s10 = sadd.s32 4294967295, %s1782_s30   ;;  %p1554_p0 = scmp.ge.s32.totalorder %s1782_s30, 1  ;;  %s1782_s30 = sphi %s1843_s30, %s19_s30  }
   0x2   : > { %p287_p1 = scmp.lt.s32.totalorder %s1782_s30, 3 }
   0x4   : > { %p288_p2 = pnand %p1554_p0, %p287_p1 }
   0x5   : > { %p1851_p3 = scmp.lt.s32.totalorder (!%p288_p2), %s1550_s10, 1  ;;  %vm399_vm0 = vcmask (!%p288_p2), 31744   ;;  %vm401_vm1 = vcmask (!%p288_p2), 25600   ;;  %v1784_v0 = vmov (!%p288_p2), 0.0   ;;  %s1785_s16 = smov (!%p288_p2), 124   ;;  %v636_v55 = vld [vmem:[%s2448_s1] sm:$0xff] (!%p288_p2) }
   0x6   : > { %291 = sbr.rel (%p288_p2) target bundleno = 1214 (0x4be), region = 56  ;;  %403 = vst.msk [vmem:[#allocation2 + $0x10] sm:$0xff] (!%p288_p2), %vm399_vm0, %v1784_v0  ;;  %400 = vst.msk [vmem:[#allocation2] sm:$0xff] (!%p288_p2), %vm399_vm0, %v1784_v0  ;;  %s1786_s17 = smov (!%p288_p2), 4   ;;  %v637_v56 = vld [vmem:[%s2448_s1 + $0x8] sm:$0xff] (!%p288_p2)  ;;  %vm673_vm2 = vcmask (!%p288_p2), 1043456  }
   0x7   : > { %404 = vst.msk [vmem:[#allocation2 + $0x18] sm:$0x3] (!%p288_p2), %vm401_vm1, %v1784_v0  ;;  %402 = vst.msk [vmem:[#allocation2 + $0x8] sm:$0x3] (!%p288_p2), %vm401_vm1, %v1784_v0  ;;  %s1787_s18 = smov (!%p288_p2), 8   ;;  %v1707_v58 = vpack.c.bf16 (!%p288_p2), %v637_v56, %v636_v55  ;;  %vm550_vm3 = vcmask (!%p288_p2), 64512  }
   0x8   : > { %405 = vst.msk [vmem:[#allocation2 + $0x20] sm:$0xff] (!%p288_p2), %vm399_vm0, %v1784_v0  ;;  %407 = vst.msk [vmem:[#allocation2 + $0x30] sm:$0xff] (!%p288_p2), %vm399_vm0, %v1784_v0  ;;  %s1788_s29 = smov (!%p288_p2), 12   ;;  %s1789_s11 = smov (!%p288_p2), 24   ;;  %vm618_vm4 = vcmask (!%p288_p2), 97280   ;;  %vm627_vm5 = vcmask (!%p288_p2), 195584  }
   0x9   : > { %406 = vst.msk [vmem:[#allocation2 + $0x28] sm:$0x3] (!%p288_p2), %vm401_vm1, %v1784_v0  ;;  %408 = vst.msk [vmem:[#allocation2 + $0x38] sm:$0x3] (!%p288_p2), %vm401_vm1, %v1784_v0  ;;  %1708 = vmatprep.subr.bf16.mxu0 (!%p288_p2), %v1707_v58  ;;  %vm648_vm6 = vcmask (!%p288_p2), 293888   ;;  %vm782_vm7 = vcmask (!%p288_p2), 261120  }
   0xa   : > { %409 = vst.msk [vmem:[#allocation2 + $0x40] sm:$0xff] (!%p288_p2), %vm399_vm0, %v1784_v0  ;;  %411 = vst.msk [vmem:[#allocation2 + $0x50] sm:$0xff] (!%p288_p2), %vm399_vm0, %v1784_v0  ;;  %1710 = vmatpush3.bf16.msra.mxu0 (!%p288_p2), %v1707_v58  ;;  %vm885_vm8 = vcmask (!%p288_p2), 254976   ;;  %s1791_s19 = smov (!%p288_p2), 64   ;;  %vm1034_vm9 = vcmask (!%p288_p2), 523264   ;;  %s1792_s22 = smov (!%p288_p2), 96  }
   0xb   : > { %410 = vst.msk [vmem:[#allocation2 + $0x48] sm:$0x3] (!%p288_p2), %vm401_vm1, %v1784_v0  ;;  %412 = vst.msk [vmem:[#allocation2 + $0x58] sm:$0x3] (!%p288_p2), %vm401_vm1, %v1784_v0  ;;  %vm1102_vm10 = vcmask (!%p288_p2), 785408  }
   0xc   : > { %413 = vst.msk [vmem:[#allocation2 + $0x60] sm:$0xff] (!%p288_p2), %vm399_vm0, %v1784_v0  ;;  %415 = vst.msk [vmem:[#allocation2 + $0x70] sm:$0xff] (!%p288_p2), %vm399_vm0, %v1784_v0 }
   0xd   : > { %414 = vst.msk [vmem:[#allocation2 + $0x68] sm:$0x3] %vm401_vm1, %v1784_v0  ;;  %416 = vst.msk [vmem:[#allocation2 + $0x78] sm:$0x3] %vm401_vm1, %v1784_v0  ;;  %s2459_s10 = smov (!%p1851_p3, %s1550_s10), 1 }
   0xe   : > { %417 = vst.msk [vmem:[#allocation2 + $0x80] sm:$0xff] %vm399_vm0, %v1784_v0  ;;  %419 = vst.msk [vmem:[#allocation2 + $0x90] sm:$0xff] %vm399_vm0, %v1784_v0  ;;  %s1582_s12 = sshll.u32 %s2459_s10, 7  ;;  %v440_v62 = vld [vmem:[#allocation2 + $0x1] sm:$0xff]  ;;  %s1583_s28 = sshll.u32 %s2459_s10, 6 }
   0xf   : > { %418 = vst.msk [vmem:[#allocation2 + $0x88] sm:$0x3] %vm401_vm1, %v1784_v0  ;;  %420 = vst.msk [vmem:[#allocation2 + $0x98] sm:$0x3] %vm401_vm1, %v1784_v0  ;;  %s327_s15 = scalar_lea.vmem %s2447_s0, %s1582_s12  ;;  %v450_v63 = vld [vmem:[#allocation2 + $0x2] sm:$0xff]  ;;  %s332_s12 = scalar_lea.vmem %s2456_s9, %s1583_s28 }
  0x10   : > { %v333_v1 = vld [vmem:[%s327_s15] sm:$0xff]  ;;  %v334_v2 = vld [vmem:[%s327_s15 + $0x8] sm:$0xff]  ;;  %v335_v3 = vld [vmem:[%s327_s15 + $0x10] sm:$0xff]  ;;  %884 = vst.msk [vmem:[#allocation3] sm:$0xff] %vm782_vm7, %v1784_v0 }
  0x11   : > { %v349_v4 = vmax.f32 %v333_v1, %v334_v2  ;;  %v336_v5 = vld [vmem:[%s327_s15 + $0x18] sm:$0xff]  ;;  %v337_v6 = vld [vmem:[%s327_s15 + $0x20] sm:$0xff]  ;;  %v338_v7 = vld [vmem:[%s327_s15 + $0x28] sm:$0xff]  ;;  %887 = vst.msk [vmem:[#allocation3 + $0x10] sm:$0xff] %vm782_vm7, %v1784_v0 }
  0x12   : > { %v351_v8 = vmax.f32 %v337_v6, %v338_v7  ;;  %v339_v9 = vld [vmem:[%s327_s15 + $0x30] sm:$0xff]  ;;  %v340_v10 = vld [vmem:[%s327_s15 + $0x38] sm:$0xff]  ;;  %v350_v11 = vmax.f32 %v335_v3, %v336_v5  ;;  %v341_v13 = vld [vmem:[%s327_s15 + $0x40] sm:$0xff]  ;;  %889 = vst.msk [vmem:[#allocation3 + $0x20] sm:$0xff] %vm782_vm7, %v1784_v0 }
  0x13   : > { %365 = vrot.lane.b32.xlu0 %v349_v4, %s1785_s16  ;;  %v352_v12 = vmax.f32 %v339_v9, %v340_v10  ;;  %v342_v14 = vld [vmem:[%s327_s15 + $0x48] sm:$0xff]  ;;  %v343_v15 = vld [vmem:[%s327_s15 + $0x50] sm:$0xff]  ;;  %v344_v16 = vld [vmem:[%s327_s15 + $0x58] sm:$0xff]  ;;  %891 = vst.msk [vmem:[#allocation3 + $0x30] sm:$0xff] %vm782_vm7, %v1784_v0 }
  0x14   : > { %369 = vrot.lane.b32.xlu1 %v351_v8, %s1785_s16  ;;  %v353_v17 = vmax.f32 %v341_v13, %v342_v14  ;;  %v354_v18 = vmax.f32 %v343_v15, %v344_v16  ;;  %v345_v19 = vld [vmem:[%s327_s15 + $0x60] sm:$0xff]  ;;  %v346_v20 = vld [vmem:[%s327_s15 + $0x68] sm:$0xff]  ;;  %v347_v21 = vld [vmem:[%s327_s15 + $0x70] sm:$0xff]  ;;  %893 = vst.msk [vmem:[#allocation3 + $0x40] sm:$0xff] %vm782_vm7, %v1784_v0 }
  0x15   : > { %v348_v22 = vld [vmem:[%s327_s15 + $0x78] sm:$0xff]  ;;  %v355_v23 = vmax.f32 %v345_v19, %v346_v20  ;;  %v638_v1 = vld [vmem:[%s2448_s1 + $0x10] sm:$0xff]  ;;  %v640_v5 = vld [vmem:[%s2448_s1 + $0x20] sm:$0xf]  ;;  %895 = vst.msk [vmem:[#allocation3 + $0x50] sm:$0xff] %vm782_vm7, %v1784_v0 }
  0x16   : > { %v356_v24 = vmax.f32 %v347_v21, %v348_v22  ;;  %v449_v25 = vld [vmem:[#allocation2 + $0x91] sm:$0xff]  ;;  %897 = vst.msk [vmem:[#allocation3 + $0x60] sm:$0xff] %vm782_vm7, %v1784_v0  ;;  %899 = vst.msk [vmem:[#allocation3 + $0x70] sm:$0xff] %vm782_vm7, %v1784_v0 }
  0x17   : > { %367 = vrot.lane.b32.xlu0 %v350_v11, %s1785_s16  ;;  %v459_v60 = vld [vmem:[#allocation2 + $0x92] sm:$0xff]  ;;  %901 = vst.msk [vmem:[#allocation3 + $0x80] sm:$0xff] %vm782_vm7, %v1784_v0  ;;  %903 = vst.msk [vmem:[#allocation3 + $0x90] sm:$0xff] %vm782_vm7, %v1784_v0 }
  0x18   : > { %371 = vrot.lane.b32.xlu1 %v352_v12, %s1785_s16  ;;  %v639_v2 = vld [vmem:[%s2448_s1 + $0x18] sm:$0xff]  ;;  %900 = vst.msk [vmem:[#allocation3 + $0x78] sm:$0x3] %vm885_vm8, %v1784_v0  ;;  %886 = vst.msk [vmem:[#allocation3 + $0x8] sm:$0x3] %vm885_vm8, %v1784_v0 }
  0x19   : > { %v1711_v3 = vpack.c.bf16 %v639_v2, %v638_v1  ;;  %888 = vst.msk [vmem:[#allocation3 + $0x18] sm:$0x3] %vm885_vm8, %v1784_v0  ;;  %890 = vst.msk [vmem:[#allocation3 + $0x28] sm:$0x3] %vm885_vm8, %v1784_v0 }
  0x1a   : > { %892 = vst.msk [vmem:[#allocation3 + $0x38] sm:$0x3] %vm885_vm8, %v1784_v0  ;;  %894 = vst.msk [vmem:[#allocation3 + $0x48] sm:$0x3] %vm885_vm8, %v1784_v0 }
  0x1b   : > { %373 = vrot.lane.b32.xlu0 %v353_v17, %s1785_s16  ;;  %1712 = vmatprep.subr.bf16.mxu0 %v1711_v3  ;;  %896 = vst.msk [vmem:[#allocation3 + $0x58] sm:$0x3] %vm885_vm8, %v1784_v0  ;;  %898 = vst.msk [vmem:[#allocation3 + $0x68] sm:$0x3] %vm885_vm8, %v1784_v0 }
  0x1c   : > { %375 = vrot.lane.b32.xlu1 %v354_v18, %s1785_s16  ;;  %1714 = vmatpush3.bf16.msra.mxu0 %v1711_v3  ;;  %902 = vst.msk [vmem:[#allocation3 + $0x88] sm:$0x3] %vm885_vm8, %v1784_v0  ;;  %904 = vst.msk [vmem:[#allocation3 + $0x98] sm:$0x3] %vm885_vm8, %v1784_v0 }
  0x1d   : > { %1673 = vmatprep.subr.msk.mxu0 %vm673_vm2, %v640_v5 }
  0x1f   : > { %377 = vrot.lane.b32.xlu0 %v355_v23, %s1785_s16 }
  0x20   : > { %379 = vrot.lane.b32.xlu1 %v356_v24, %s1785_s16  ;;  %1674 = vmatpush3.msk.msra.mxu0 %vm673_vm2, %v640_v5 }
  0x24   : > { %488 = vrot.lane.b32.xlu1 %v449_v25, %s1786_s17 }
  0x85   : > { %v366_v26 = vpop.permute.xlu0 %365 }
  0x86   : > { %v389_v27 = vmax.f32 %v349_v4, %v366_v26  ;;  %v370_v28 = vpop.permute.xlu1 %369 }
  0x87   : > { %v391_v29 = vmax.f32 %v351_v8, %v370_v28 }
  0x88   : > { %422 = vst.msk [vmem:[#allocation2 + $0x11] sm:$0xff] %vm399_vm0, %v389_v27 }
  0x89   : > { %v368_v30 = vpop.permute.xlu0 %367  ;;  %424 = vst.msk [vmem:[#allocation2 + $0x31] sm:$0xff] %vm399_vm0, %v391_v29 }
  0x8a   : > { %v390_v31 = vmax.f32 %v350_v11, %v368_v30  ;;  %v372_v32 = vpop.permute.xlu1 %371 }
  0x8b   : > { %v392_v33 = vmax.f32 %v352_v12, %v372_v32 }
  0x8c   : > { %423 = vst.msk [vmem:[#allocation2 + $0x21] sm:$0xff] %vm399_vm0, %v390_v31 }
  0x8d   : > { %425 = vst.msk [vmem:[#allocation2 + $0x41] sm:$0xff] %vm399_vm0, %v392_v33  ;;  %v374_v34 = vpop.permute.xlu0 %373 }
  0x8e   : > { %v393_v35 = vmax.f32 %v353_v17, %v374_v34  ;;  %v376_v36 = vpop.permute.xlu1 %375 }
  0x8f   : > { %v441_v37 = vld [vmem:[#allocation2 + $0x11] sm:$0xff]  ;;  %v394_v38 = vmax.f32 %v354_v18, %v376_v36 }
  0x90   : > { %472 = vrot.lane.b32.xlu0 %v441_v37, %s1786_s17  ;;  %426 = vst.msk [vmem:[#allocation2 + $0x51] sm:$0xff] %vm399_vm0, %v393_v35  ;;  %v451_v42 = vld [vmem:[#allocation2 + $0x12] sm:$0xff] }
  0x91   : > { %427 = vst.msk [vmem:[#allocation2 + $0x61] sm:$0xff] %vm399_vm0, %v394_v38  ;;  %v378_v39 = vpop.permute.xlu0 %377  ;;  %v443_v45 = vld [vmem:[#allocation2 + $0x31] sm:$0xff] }
  0x92   : > { %v395_v40 = vmax.f32 %v355_v23, %v378_v39  ;;  %v380_v41 = vpop.permute.xlu1 %379  ;;  %v453_v48 = vld [vmem:[#allocation2 + $0x32] sm:$0xff] }
  0x93   : > { %v442_v43 = vld [vmem:[#allocation2 + $0x21] sm:$0xff]  ;;  %v396_v44 = vmax.f32 %v356_v24, %v380_v41  ;;  %v431_v7 = vld [vmem:[#allocation2 + $0x10] sm:$0xff] }
  0x94   : > { %512 = vrot.lane.b32.xlu0 %v451_v42, %s1787_s18  ;;  %474 = vrot.lane.b32.xlu1 %v442_v43, %s1786_s17  ;;  %428 = vst.msk [vmem:[#allocation2 + $0x71] sm:$0xff] %vm399_vm0, %v395_v40  ;;  %v452_v46 = vld [vmem:[#allocation2 + $0x22] sm:$0xff]  ;;  %v433_v17 = vld [vmem:[#allocation2 + $0x30] sm:$0xff] }
  0x95   : > { %429 = vst.msk [vmem:[#allocation2 + $0x81] sm:$0xff] %vm399_vm0, %v396_v44  ;;  %v444_v47 = vld [vmem:[#allocation2 + $0x41] sm:$0xff] }
  0x96   : > { %v454_v50 = vld [vmem:[#allocation2 + $0x42] sm:$0xff]  ;;  %v1943_v4 = vpop.permute.xlu1 %488 }
  0x97   : > { %v445_v49 = vld [vmem:[#allocation2 + $0x51] sm:$0xff]  ;;  %v432_v12 = vld [vmem:[#allocation2 + $0x20] sm:$0xff] }
  0x98   : > { %514 = vrot.lane.b32.xlu0 %v452_v46, %s1787_s18  ;;  %476 = vrot.lane.b32.xlu1 %v443_v45, %s1786_s17  ;;  %v446_v51 = vld [vmem:[#allocation2 + $0x61] sm:$0xff]  ;;  %v455_v52 = vld [vmem:[#allocation2 + $0x52] sm:$0xff] }
  0x99   : > { %v456_v54 = vld [vmem:[#allocation2 + $0x62] sm:$0xff]  ;;  %v435_v27 = vld [vmem:[#allocation2 + $0x50] sm:$0xff] }
  0x9a   : > { %v434_v22 = vld [vmem:[#allocation2 + $0x40] sm:$0xff]  ;;  %v439_v45 = vld [vmem:[#allocation2 + $0x90] sm:$0xff] }
  0x9b   : > { %v447_v53 = vld [vmem:[#allocation2 + $0x71] sm:$0xff]  ;;  %v436_v32 = vld [vmem:[#allocation2 + $0x60] sm:$0xff] }
  0x9c   : > { %478 = vrot.lane.b32.xlu0 %v444_v47, %s1786_s17  ;;  %516 = vrot.lane.b32.xlu1 %v453_v48, %s1787_s18  ;;  %v448_v57 = vld [vmem:[#allocation2 + $0x81] sm:$0xff]  ;;  %v457_v59 = vld [vmem:[#allocation2 + $0x72] sm:$0xff]  ;;  %v549_v48 = vsel %vm399_vm0, %v439_v45, %v1943_v4 }
  0x9d   : > { %v458_v61 = vld [vmem:[#allocation2 + $0x82] sm:$0xff]  ;;  %v437_v37 = vld [vmem:[#allocation2 + $0x70] sm:$0xff] }
  0x9e   : > { %v438_v42 = vld [vmem:[#allocation2 + $0x80] sm:$0xff] }
  0xa0   : > { %518 = vrot.lane.b32.xlu0 %v454_v50, %s1787_s18  ;;  %480 = vrot.lane.b32.xlu1 %v445_v49, %s1786_s17 }
  0xa4   : > { %482 = vrot.lane.b32.xlu0 %v446_v51, %s1786_s17  ;;  %520 = vrot.lane.b32.xlu1 %v455_v52, %s1787_s18  ;;  %v430_v51 = vld [vmem:[#allocation2] sm:$0xff] }
  0xa8   : > { %522 = vrot.lane.b32.xlu0 %v456_v54, %s1787_s18  ;;  %484 = vrot.lane.b32.xlu1 %v447_v53, %s1786_s17 }
  0xac   : > { %486 = vrot.lane.b32.xlu0 %v448_v57, %s1786_s17  ;;  %524 = vrot.lane.b32.xlu1 %v457_v59, %s1787_s18 }
  0xb0   : > { %526 = vrot.lane.b32.xlu0 %v458_v61, %s1787_s18  ;;  %528 = vrot.lane.b32.xlu1 %v459_v60, %s1787_s18 }
  0xb4   : > { %470 = vrot.lane.b32.xlu0 %v440_v62, %s1786_s17  ;;  %510 = vrot.lane.b32.xlu1 %v450_v63, %s1787_s18  ;;  %s1790_s18 = smov 32  }
 0x102   : > { %v473_v6 = vpop.permute.xlu0 %472 }
 0x103   : > { %v541_v8 = vsel %vm399_vm0, %v431_v7, %v473_v6 }
 0x106   : > { %v475_v9 = vpop.permute.xlu1 %474  ;;  %v513_v10 = vpop.permute.xlu0 %512 }
 0x107   : > { %v1950_v11 = vsel %vm550_vm3, %v541_v8, %v513_v10  ;;  %v542_v13 = vsel %vm399_vm0, %v432_v12, %v475_v9 }
 0x108   : > { %569 = vrot.lane.b32.xlu0 %v1950_v11, %s1788_s29 }
 0x10a   : > { %v477_v14 = vpop.permute.xlu1 %476  ;;  %v515_v15 = vpop.permute.xlu0 %514 }
 0x10b   : > { %v1956_v16 = vsel %vm550_vm3, %v542_v13, %v515_v15  ;;  %v543_v18 = vsel %vm399_vm0, %v433_v17, %v477_v14 }
 0x10c   : > { %594 = vrot.lane.b32.xlu0 %v1956_v16, %s1789_s11  ;;  %571 = vrot.lane.b32.xlu1 %v1956_v16, %s1788_s29 }
 0x10e   : > { %v517_v19 = vpop.permute.xlu1 %516  ;;  %v479_v20 = vpop.permute.xlu0 %478 }
 0x10f   : > { %v1964_v21 = vsel %vm550_vm3, %v543_v18, %v517_v19  ;;  %v544_v23 = vsel %vm399_vm0, %v434_v22, %v479_v20 }
 0x110   : > { %573 = vrot.lane.b32.xlu0 %v1964_v21, %s1788_s29  ;;  %596 = vrot.lane.b32.xlu1 %v1964_v21, %s1789_s11 }
 0x112   : > { %v481_v24 = vpop.permute.xlu1 %480  ;;  %v519_v25 = vpop.permute.xlu0 %518 }
 0x113   : > { %v1972_v26 = vsel %vm550_vm3, %v544_v23, %v519_v25  ;;  %v545_v28 = vsel %vm399_vm0, %v435_v27, %v481_v24  ;;  %v1559_v24 = vld [vmem:[%s2449_s2] ss:$0 sm:$0xff] }
 0x114   : > { %598 = vrot.lane.b32.xlu0 %v1972_v26, %s1789_s11  ;;  %575 = vrot.lane.b32.xlu1 %v1972_v26, %s1788_s29 }
 0x116   : > { %v521_v29 = vpop.permute.xlu1 %520  ;;  %v483_v30 = vpop.permute.xlu0 %482 }
 0x117   : > { %v1980_v31 = vsel %vm550_vm3, %v545_v28, %v521_v29  ;;  %v546_v33 = vsel %vm399_vm0, %v436_v32, %v483_v30 }
 0x118   : > { %577 = vrot.lane.b32.xlu0 %v1980_v31, %s1788_s29  ;;  %600 = vrot.lane.b32.xlu1 %v1980_v31, %s1789_s11 }
 0x11a   : > { %v485_v34 = vpop.permute.xlu1 %484  ;;  %v523_v35 = vpop.permute.xlu0 %522 }
 0x11b   : > { %v557_v36 = vsel %vm550_vm3, %v546_v33, %v523_v35  ;;  %v547_v38 = vsel %vm399_vm0, %v437_v37, %v485_v34 }
 0x11c   : > { %602 = vrot.lane.b32.xlu0 %v557_v36, %s1789_s11  ;;  %579 = vrot.lane.b32.xlu1 %v557_v36, %s1788_s29 }
 0x11e   : > { %v525_v39 = vpop.permute.xlu1 %524  ;;  %v487_v40 = vpop.permute.xlu0 %486 }
 0x11f   : > { %v558_v41 = vsel %vm550_vm3, %v547_v38, %v525_v39  ;;  %v548_v43 = vsel %vm399_vm0, %v438_v42, %v487_v40 }
 0x120   : > { %581 = vrot.lane.b32.xlu0 %v558_v41, %s1788_s29  ;;  %604 = vrot.lane.b32.xlu1 %v558_v41, %s1789_s11 }
 0x122   : > { %v527_v44 = vpop.permute.xlu0 %526  ;;  %v529_v47 = vpop.permute.xlu1 %528 }
 0x123   : > { %v559_v46 = vsel %vm550_vm3, %v548_v43, %v527_v44  ;;  %v560_v49 = vsel %vm550_vm3, %v549_v48, %v529_v47 }
 0x124   : > { %606 = vrot.lane.b32.xlu0 %v559_v46, %s1789_s11  ;;  %583 = vrot.lane.b32.xlu1 %v559_v46, %s1788_s29 }
 0x126   : > { %v471_v50 = vpop.permute.xlu0 %470  ;;  %v511_v53 = vpop.permute.xlu1 %510 }
 0x127   : > { %v540_v52 = vsel %vm399_vm0, %v430_v51, %v471_v50 }
 0x128   : > { %608 = vrot.lane.b32.xlu1 %v560_v49, %s1789_s11  ;;  %v551_v55 = vsel %vm550_vm3, %v540_v52, %v511_v53 }
 0x17a   : > { %v570_v54 = vpop.permute.xlu0 %569 }
 0x17b   : > { %v619_v56 = vsel %vm618_vm4, %v551_v55, %v570_v54 }
 0x17e   : > { %v572_v57 = vpop.permute.xlu1 %571  ;;  %v595_v58 = vpop.permute.xlu0 %594 }
 0x17f   : > { %v628_v59 = vsel %vm627_vm5, %v619_v56, %v595_v58  ;;  %v620_v60 = vsel %vm618_vm4, %v1950_v11, %v572_v57 }
 0x180   : > { %1675 = vmatprep.mubr.msk.f32.mxu0 %vm648_vm6, %v628_v59 }
 0x182   : > { %v597_v61 = vpop.permute.xlu1 %596  ;;  %v574_v62 = vpop.permute.xlu0 %573 }
 0x183   : > { %v629_v63 = vsel %vm627_vm5, %v620_v60, %v597_v61  ;;  %v621_v1 = vsel %vm618_vm4, %v1956_v16, %v574_v62 }
 0x184   : > { %1676 = vmatmul.mubr.msk.f32.vlgmr.msra.gmra.mrb[0].mxu0 %vm648_vm6, %v629_v63 }
 0x186   : > { %v576_v2 = vpop.permute.xlu1 %575  ;;  %v599_v3 = vpop.permute.xlu0 %598 }
 0x187   : > { %v630_v4 = vsel %vm627_vm5, %v621_v1, %v599_v3  ;;  %v622_v5 = vsel %vm618_vm4, %v1964_v21, %v576_v2 }
 0x188   : > { %1678 = vmatprep.mubr.msk.f32.mxu0 %vm648_vm6, %v630_v4 }
 0x18a   : > { %v601_v6 = vpop.permute.xlu1 %600  ;;  %v578_v7 = vpop.permute.xlu0 %577 }
 0x18b   : > { %v631_v8 = vsel %vm627_vm5, %v622_v5, %v601_v6  ;;  %v623_v9 = vsel %vm618_vm4, %v1972_v26, %v578_v7 }
 0x18c   : > { %1679 = vmatmul.mubr.msk.f32.gmra.mrb[2].mxu0 %vm648_vm6, %v631_v8 }
 0x18e   : > { %v580_v10 = vpop.permute.xlu1 %579  ;;  %v603_v11 = vpop.permute.xlu0 %602 }
 0x18f   : > { %v632_v12 = vsel %vm627_vm5, %v623_v9, %v603_v11  ;;  %v624_v13 = vsel %vm618_vm4, %v1980_v31, %v580_v10 }
 0x190   : > { %1681 = vmatprep.mubr.msk.f32.mxu0 %vm648_vm6, %v632_v12 }
 0x192   : > { %v605_v14 = vpop.permute.xlu1 %604  ;;  %v582_v15 = vpop.permute.xlu0 %581 }
 0x193   : > { %v633_v16 = vsel %vm627_vm5, %v624_v13, %v605_v14  ;;  %v625_v17 = vsel %vm618_vm4, %v557_v36, %v582_v15 }
 0x194   : > { %1682 = vmatmul.mubr.msk.f32.gmra.mrb[4].mxu0 %vm648_vm6, %v633_v16 }
 0x196   : > { %v584_v18 = vpop.permute.xlu1 %583  ;;  %v607_v19 = vpop.permute.xlu0 %606 }
 0x197   : > { %v634_v20 = vsel %vm627_vm5, %v625_v17, %v607_v19  ;;  %v626_v21 = vsel %vm618_vm4, %v558_v41, %v584_v18 }
 0x198   : > { %1684 = vmatprep.mubr.msk.f32.mxu0 %vm648_vm6, %v634_v20 }
 0x19a   : > { %v609_v22 = vpop.permute.xlu1 %608 }
 0x19b   : > { %v635_v23 = vsel %vm627_vm5, %v626_v21, %v609_v22 }
 0x19c   : > { %1685 = vmatmul.mubr.msk.f32.gmra.mrb[6].mxu0 %vm648_vm6, %v635_v23 }
 0x257   : > { %v1677_v25 = vpop.f32.mrb[0].mxu0 }
 0x258   : > { %v2066_v26 = vadd.f32 %v1677_v25, %v1559_v24  ;;  %v743_v27 = vpop.f32.mrb[1].mxu0 }
 0x259   : > { %v2068_v28 = vadd.f32 %v1559_v24, %v743_v27 }
 0x25a   : > { %v784_v29 = vsel %vm782_vm7, %v2066_v26, 0.0  ;;  %v805_v30 = vmul.f32 %v2066_v26, %v2066_v26 }
 0x25b   : > { %v783_v31 = vsel %vm782_vm7, %v2068_v28, 0.0  ;;  %v804_v0 = vmul.f32 %v2068_v28, %v2068_v28 }
 0x25c   : > { %v813_v32 = vsel %vm782_vm7, %v805_v30, 0.0  ;;  %v785_v33 = vadd.f32 %v784_v29, %v783_v31 }
 0x25d   : > { %v812_v34 = vsel %vm782_vm7, %v804_v0, 0.0 }
 0x25e   : > { %v814_v35 = vadd.f32 %v813_v32, %v812_v34 }
 0x25f   : > { %v1680_v36 = vpop.f32.mrb[2].mxu0 }
 0x260   : > { %v2080_v37 = vadd.f32 %v1680_v36, %v1559_v24  ;;  %v753_v38 = vpop.f32.mrb[3].mxu0 }
 0x261   : > { %v2082_v39 = vadd.f32 %v1559_v24, %v753_v38 }
 0x262   : > { %v807_v40 = vmul.f32 %v2080_v37, %v2080_v37  ;;  %v788_v44 = vsel %vm782_vm7, %v2080_v37, 0.0 }
 0x263   : > { %v786_v41 = vsel %vm782_vm7, %v2082_v39, 0.0  ;;  %v806_v42 = vmul.f32 %v2082_v39, %v2082_v39 }
 0x264   : > { %v787_v43 = vadd.f32 %v786_v41, %v785_v33  ;;  %v817_v48 = vsel %vm782_vm7, %v807_v40, 0.0 }
 0x265   : > { %v815_v45 = vsel %vm782_vm7, %v806_v42, 0.0 }
 0x266   : > { %v816_v46 = vadd.f32 %v815_v45, %v814_v35  ;;  %v789_v47 = vadd.f32 %v788_v44, %v787_v43  ;;  %v848_v43 = vlaneseq }
 0x267   : > { %v1683_v49 = vpop.f32.mrb[4].mxu0 }
 0x268   : > { %v2094_v50 = vadd.f32 %v1683_v49, %v1559_v24  ;;  %v763_v51 = vpop.f32.mrb[5].mxu0  ;;  %v818_v52 = vadd.f32 %v817_v48, %v816_v46  ;;  %v2118_v44 = vshrl.u32 %v848_v43, 7  ;;  %v1569_v46 = vld [vmem:[%s2451_s4] ss:$0 sm:$0xff]  ;;  %v1124_v43 = vld [vmem:[%s2452_s5 + $0x28] sm:$0xff] }
 0x269   : > { %v2096_v53 = vadd.f32 %v1559_v24, %v763_v51 }
 0x26a   : > { %v809_v54 = vmul.f32 %v2094_v50, %v2094_v50  ;;  %v792_v58 = vsel %vm782_vm7, %v2094_v50, 0.0 }
 0x26b   : > { %v790_v55 = vsel %vm782_vm7, %v2096_v53, 0.0  ;;  %v808_v56 = vmul.f32 %v2096_v53, %v2096_v53 }
 0x26c   : > { %v791_v57 = vadd.f32 %v790_v55, %v789_v47  ;;  %v821_v62 = vsel %vm782_vm7, %v809_v54, 0.0 }
 0x26d   : > { %v819_v59 = vsel %vm782_vm7, %v808_v56, 0.0 }
 0x26e   : > { %v820_v60 = vadd.f32 %v819_v59, %v818_v52  ;;  %v793_v61 = vadd.f32 %v792_v58, %v791_v57 }
 0x26f   : > { %v1686_v63 = vpop.f32.mrb[6].mxu0 }
 0x270   : > { %v779_v1 = vadd.f32 %v1686_v63, %v1559_v24  ;;  %v773_v2 = vpop.f32.mrb[7].mxu0  ;;  %v822_v3 = vadd.f32 %v821_v62, %v820_v60 }
 0x271   : > { %v774_v4 = vadd.f32 %v1559_v24, %v773_v2 }
 0x272   : > { %v811_v5 = vmul.f32 %v779_v1, %v779_v1  ;;  %v796_v9 = vsel %vm782_vm7, %v779_v1, 0.0 }
 0x273   : > { %v794_v6 = vsel %vm782_vm7, %v774_v4, 0.0  ;;  %v810_v7 = vmul.f32 %v774_v4, %v774_v4 }
 0x274   : > { %v795_v8 = vadd.f32 %v794_v6, %v793_v61  ;;  %v825_v13 = vsel %vm782_vm7, %v811_v5, 0.0 }
 0x275   : > { %v823_v10 = vsel %vm782_vm7, %v810_v7, 0.0 }
 0x276   : > { %v797_v11 = vadd.f32 %v796_v9, %v795_v8  ;;  %v824_v12 = vadd.f32 %v823_v10, %v822_v3 }
 0x278   : > { %v798_v14 = vrot.slane %v797_v11, 4  ;;  %v826_v15 = vadd.f32 %v825_v13, %v824_v12 }
 0x27a   : > { %v799_v16 = vadd.f32 %v798_v14, %v797_v11  ;;  %v827_v17 = vrot.slane %v826_v15, 4 }
 0x27c   : > { %v800_v18 = vrot.slane %v799_v16, 2  ;;  %v828_v19 = vadd.f32 %v827_v17, %v826_v15 }
 0x27e   : > { %v801_v20 = vadd.f32 %v800_v18, %v799_v16  ;;  %v829_v21 = vrot.slane %v828_v19, 2 }
 0x280   : > { %v802_v22 = vrot.slane %v801_v20, 1  ;;  %v830_v23 = vadd.f32 %v829_v21, %v828_v19  ;;  %v1135_v21 = vld [vmem:[%s2452_s5 + $0x80] sm:$0xff] }
 0x282   : > { %v803_v24 = vadd.f32 %v802_v22, %v801_v20  ;;  %v831_v25 = vrot.slane %v830_v23, 1  ;;  %v1136_v22 = vld [vmem:[%s2452_s5 + $0x88] sm:$0xff] }
 0x284   : > { %v832_v27 = vadd.f32 %v831_v25, %v830_v23  ;;  %v833_v29 = vmul.f32 0.015625, %v803_v24  ;;  %v1119_v23 = vld [vmem:[%s2452_s5] sm:$0xff]  ;;  %v1715_v24 = vpack.c.bf16 %v1136_v22, %v1135_v21  ;;  %v1120_v25 = vld [vmem:[%s2452_s5 + $0x8] sm:$0xff] }
 0x286   : > { %v834_v30 = vmul.f32 0.015625, %v832_v27  ;;  %v835_v31 = vmul.f32 %v833_v29, %v833_v29  ;;  %v839_v0 = vsub.f32 %v2068_v28, %v833_v29  ;;  %v840_v32 = vsub.f32 %v2066_v26, %v833_v29  ;;  %v397_v26 = vld [vmem:[%s2450_s3] sm:$0x1]  ;;  %v1137_v27 = vld [vmem:[%s2452_s5 + $0x90] sm:$0xff]  ;;  %1716 = vmatprep.subr.bf16.mxu1 %v1715_v24 }
 0x287   : > { %v841_v33 = vsub.f32 %v2082_v39, %v833_v29  ;;  %v842_v34 = vsub.f32 %v2080_v37, %v833_v29  ;;  %v843_v35 = vsub.f32 %v2096_v53, %v833_v29  ;;  %v844_v36 = vsub.f32 %v2094_v50, %v833_v29 }
 0x288   : > { %v836_v38 = vsub.f32 %v834_v30, %v835_v31  ;;  %v845_v40 = vsub.f32 %v774_v4, %v833_v29  ;;  %v846_v41 = vsub.f32 %v779_v1, %v833_v29  ;;  %v850_v28 = vsub.s32 0, %v2118_v44  ;;  %v1138_v29 = vld [vmem:[%s2452_s5 + $0x98] sm:$0xff] }
 0x289   : > { %v1717_v31 = vpack.c.bf16 %v1120_v25, %v1119_v23 }
 0x28a   : > { %v837_v42 = vadd.f32 1e-05, %v836_v38 }
 0x28b   : > { %1718 = vmatpush3.bf16.msra.mxu1 %v1717_v31 }
 0x28c   : > { %1772 = vrsqrt.f32 %v837_v42  ;;  %v1123_v42 = vld [vmem:[%s2452_s5 + $0x20] sm:$0xff] }
 0x296   : > { %v1773_v39 = vpop.eup %1772 }
 0x297   : > { %v847_v37 = vmul.f32 %v1773_v39, %v397_v26  ;;  %v1141_v26 = vld [vmem:[%s2452_s5 + $0xb0] sm:$0xff]  ;;  %v1142_v39 = vld [vmem:[%s2452_s5 + $0xb8] sm:$0xff] }
 0x299   : > { %v851_v45 = vrot.slane %v847_v37, %v850_v28  ;;  %v933_v37 = vld [vmem:[#allocation3 + $0x91] sm:$0xff] }
 0x29b   : > { %v852_v47 = vmul.f32 %v851_v45, %v839_v0  ;;  %v853_v48 = vmul.f32 %v851_v45, %v840_v32  ;;  %v854_v49 = vmul.f32 %v851_v45, %v841_v33  ;;  %v855_v50 = vmul.f32 %v851_v45, %v842_v34  ;;  %v1121_v32 = vld [vmem:[%s2452_s5 + $0x10] sm:$0xff]  ;;  %v1122_v33 = vld [vmem:[%s2452_s5 + $0x18] sm:$0xff]  ;;  %v1139_v34 = vld [vmem:[%s2452_s5 + $0xa0] sm:$0xff] }
 0x29c   : > { %v856_v51 = vmul.f32 %v851_v45, %v843_v35  ;;  %v857_v52 = vmul.f32 %v851_v45, %v844_v36  ;;  %v858_v53 = vmul.f32 %v851_v45, %v845_v40  ;;  %v859_v54 = vmul.f32 %v851_v45, %v846_v41  ;;  %v1140_v35 = vld [vmem:[%s2452_s5 + $0xa8] sm:$0xff]  ;;  %v943_v45 = vld [vmem:[#allocation3 + $0x92] sm:$0xff] }
 0x29d   : > { %v866_v55 = vadd.f32 %v1569_v46, %v852_v47  ;;  %v867_v56 = vadd.f32 %v1569_v46, %v853_v48  ;;  %v868_v57 = vadd.f32 %v1569_v46, %v854_v49  ;;  %v869_v58 = vadd.f32 %v1569_v46, %v855_v50  ;;  %v1125_v47 = vld [vmem:[%s2452_s5 + $0x30] sm:$0xff]  ;;  %v1126_v49 = vld [vmem:[%s2452_s5 + $0x38] sm:$0xff]  ;;  %v1151_v50 = vld [vmem:[%s2452_s5 + $0x100] sm:$0xff] }
 0x29e   : > { %v870_v59 = vadd.f32 %v1569_v46, %v856_v51  ;;  %v871_v60 = vadd.f32 %v1569_v46, %v857_v52  ;;  %v872_v61 = vadd.f32 %v1569_v46, %v858_v53  ;;  %v873_v62 = vadd.f32 %v1569_v46, %v859_v54  ;;  %v1152_v51 = vld [vmem:[%s2452_s5 + $0x108] sm:$0xff]  ;;  %v1143_v52 = vld [vmem:[%s2452_s5 + $0xc0] sm:$0xff] }
 0x29f   : > { %v874_v63 = vmax.f32 %v866_v55, 0.0  ;;  %v875_v1 = vmax.f32 %v867_v56, 0.0  ;;  %v876_v2 = vmax.f32 %v868_v57, 0.0  ;;  %v877_v3 = vmax.f32 %v869_v58, 0.0  ;;  %v1144_v53 = vld [vmem:[%s2452_s5 + $0xc8] sm:$0xff] }
 0x2a0   : > { %v878_v4 = vmax.f32 %v870_v59, 0.0  ;;  %v879_v5 = vmax.f32 %v871_v60, 0.0  ;;  %v880_v6 = vmax.f32 %v872_v61, 0.0  ;;  %v881_v7 = vmax.f32 %v873_v62, 0.0  ;;  %v934_v55 = vld [vmem:[#allocation3 + $0x2] sm:$0xff]  ;;  %v1145_v61 = vld [vmem:[%s2452_s5 + $0xd0] sm:$0xff] }
 0x2a1   : > { %907 = vst.msk [vmem:[#allocation3 + $0x21] sm:$0xff] %vm782_vm7, %v875_v1  ;;  %906 = vst.msk [vmem:[#allocation3 + $0x11] sm:$0xff] %vm782_vm7, %v874_v63  ;;  %v1719_v0 = vpack.c.bf16 %v1138_v29, %v1137_v27  ;;  %v1721_v38 = vpack.c.bf16 %v1122_v33, %v1121_v32  ;;  %v1723_v41 = vpack.c.bf16 %v1140_v35, %v1139_v34  ;;  %v924_v56 = vld [vmem:[#allocation3 + $0x1] sm:$0xff]  ;;  %v1146_v62 = vld [vmem:[%s2452_s5 + $0xd8] sm:$0xff] }
 0x2a2   : > { %908 = vst.msk [vmem:[#allocation3 + $0x31] sm:$0xff] %vm782_vm7, %v876_v2  ;;  %909 = vst.msk [vmem:[#allocation3 + $0x41] sm:$0xff] %vm782_vm7, %v877_v3  ;;  %v1725_v46 = vpack.c.bf16 %v1124_v43, %v1123_v42  ;;  %v1727_v48 = vpack.c.bf16 %v1142_v39, %v1141_v26  ;;  %v1747_v54 = vpack.c.bf16 %v1152_v51, %v1151_v50  ;;  %v1127_v59 = vld [vmem:[%s2452_s5 + $0x40] sm:$0xff]  ;;  %v1128_v60 = vld [vmem:[%s2452_s5 + $0x48] sm:$0xff] }
 0x2a3   : > { %912 = vst.msk [vmem:[#allocation3 + $0x71] sm:$0xff] %vm782_vm7, %v880_v6  ;;  %910 = vst.msk [vmem:[#allocation3 + $0x51] sm:$0xff] %vm782_vm7, %v878_v4  ;;  %1720 = vmatprep.subr.bf16.mxu1 %v1719_v0  ;;  %v1729_v57 = vpack.c.bf16 %v1126_v49, %v1125_v47  ;;  %v1731_v58 = vpack.c.bf16 %v1144_v53, %v1143_v52  ;;  %v1733_v63 = vpack.c.bf16 %v1128_v60, %v1127_v59  ;;  %v1129_v2 = vld [vmem:[%s2452_s5 + $0x50] sm:$0xff]  ;;  %v1130_v3 = vld [vmem:[%s2452_s5 + $0x58] sm:$0xff] }
 0x2a4   : > { %911 = vst.msk [vmem:[#allocation3 + $0x61] sm:$0xff] %vm782_vm7, %v879_v5  ;;  %913 = vst.msk [vmem:[#allocation3 + $0x81] sm:$0xff] %vm782_vm7, %v881_v7  ;;  %1722 = vmatpush3.bf16.msra.mxu1 %v1721_v38  ;;  %1748 = vmatprep.subr.bf16.mxu0 %v1747_v54  ;;  %v1735_v1 = vpack.c.bf16 %v1146_v62, %v1145_v61  ;;  %v1147_v4 = vld [vmem:[%s2452_s5 + $0xe0] sm:$0xff]  ;;  %v1148_v5 = vld [vmem:[%s2452_s5 + $0xe8] sm:$0xff]  ;;  %v1737_v6 = vpack.c.bf16 %v1130_v3, %v1129_v2 }
 0x2a5   : > { %1724 = vmatprep.subr.bf16.mxu1 %v1723_v41  ;;  %1750 = vmatpush3.bf16.msra.mxu0 %v1747_v54  ;;  %v1739_v7 = vpack.c.bf16 %v1148_v5, %v1147_v4  ;;  %v923_v61 = vld [vmem:[#allocation3 + $0x90] sm:$0xff]  ;;  %v914_v4 = vld [vmem:[#allocation3] sm:$0xff] }
 0x2a8   : > { %v926_v8 = vld [vmem:[#allocation3 + $0x21] sm:$0xff]  ;;  %v925_v9 = vld [vmem:[#allocation3 + $0x11] sm:$0xff]  ;;  %1726 = vmatpush3.bf16.msra.mxu1 %v1725_v46 }
 0x2a9   : > { %958 = vrot.lane.b32.xlu1 %v926_v8, %s1790_s18  ;;  %956 = vrot.lane.b32.xlu0 %v925_v9, %s1790_s18  ;;  %v936_v10 = vld [vmem:[#allocation3 + $0x22] sm:$0xff]  ;;  %v935_v11 = vld [vmem:[#allocation3 + $0x12] sm:$0xff] }
 0x2aa   : > { %v937_v12 = vld [vmem:[#allocation3 + $0x32] sm:$0xff]  ;;  %v938_v14 = vld [vmem:[#allocation3 + $0x42] sm:$0xff]  ;;  %1728 = vmatprep.subr.bf16.mxu1 %v1727_v48 }
 0x2ab   : > { %v927_v13 = vld [vmem:[#allocation3 + $0x31] sm:$0xff]  ;;  %v928_v15 = vld [vmem:[#allocation3 + $0x41] sm:$0xff] }
 0x2ac   : > { %v939_v16 = vld [vmem:[#allocation3 + $0x52] sm:$0xff]  ;;  %v940_v18 = vld [vmem:[#allocation3 + $0x62] sm:$0xff]  ;;  %1730 = vmatpush3.bf16.msra.mxu1 %v1729_v57 }
 0x2ad   : > { %998 = vrot.lane.b32.xlu1 %v936_v10, %s1791_s19  ;;  %996 = vrot.lane.b32.xlu0 %v935_v11, %s1791_s19  ;;  %v929_v17 = vld [vmem:[#allocation3 + $0x51] sm:$0xff]  ;;  %v930_v19 = vld [vmem:[#allocation3 + $0x61] sm:$0xff] }
 0x2ae   : > { %v941_v20 = vld [vmem:[#allocation3 + $0x72] sm:$0xff]  ;;  %v942_v36 = vld [vmem:[#allocation3 + $0x82] sm:$0xff]  ;;  %1732 = vmatprep.subr.bf16.mxu1 %v1731_v58 }
 0x2af   : > { %v931_v30 = vld [vmem:[#allocation3 + $0x71] sm:$0xff]  ;;  %v932_v40 = vld [vmem:[#allocation3 + $0x81] sm:$0xff] }
 0x2b0   : > { %1734 = vmatpush3.bf16.msra.mxu1 %v1733_v63  ;;  %v1131_v8 = vld [vmem:[%s2452_s5 + $0x60] sm:$0xff]  ;;  %v1132_v9 = vld [vmem:[%s2452_s5 + $0x68] sm:$0xff]  ;;  %v1149_v10 = vld [vmem:[%s2452_s5 + $0xf0] sm:$0xff] }
 0x2b1   : > { %1000 = vrot.lane.b32.xlu1 %v937_v12, %s1791_s19  ;;  %960 = vrot.lane.b32.xlu0 %v927_v13, %s1790_s18  ;;  %v1150_v11 = vld [vmem:[%s2452_s5 + $0xf8] sm:$0xff]  ;;  %v1741_v12 = vpack.c.bf16 %v1132_v9, %v1131_v8  ;;  %v916_v22 = vld [vmem:[#allocation3 + $0x20] sm:$0xff]  ;;  %v915_v23 = vld [vmem:[#allocation3 + $0x10] sm:$0xff] }
 0x2b2   : > { %1736 = vmatprep.subr.bf16.mxu1 %v1735_v1  ;;  %v1743_v13 = vpack.c.bf16 %v1150_v11, %v1149_v10  ;;  %v917_v32 = vld [vmem:[#allocation3 + $0x30] sm:$0xff]  ;;  %v918_v38 = vld [vmem:[#allocation3 + $0x40] sm:$0xff] }
 0x2b3   : > { %v919_v26 = vld [vmem:[#allocation3 + $0x50] sm:$0xff]  ;;  %v920_v47 = vld [vmem:[#allocation3 + $0x60] sm:$0xff] }
 0x2b4   : > { %1738 = vmatpush3.bf16.msra.mxu1 %v1737_v6  ;;  %v921_v52 = vld [vmem:[#allocation3 + $0x70] sm:$0xff]  ;;  %v922_v57 = vld [vmem:[#allocation3 + $0x80] sm:$0xff] }
 0x2b5   : > { %1002 = vrot.lane.b32.xlu1 %v938_v14, %s1791_s19  ;;  %962 = vrot.lane.b32.xlu0 %v928_v15, %s1790_s18  ;;  %v1133_v14 = vld [vmem:[%s2452_s5 + $0x70] sm:$0xff]  ;;  %v1134_v15 = vld [vmem:[%s2452_s5 + $0x78] sm:$0xff] }
 0x2b6   : > { %1740 = vmatprep.subr.bf16.mxu1 %v1739_v7 }
 0x2b8   : > { %1742 = vmatpush3.bf16.msra.mxu1 %v1741_v12 }
 0x2b9   : > { %1004 = vrot.lane.b32.xlu1 %v939_v16, %s1791_s19  ;;  %964 = vrot.lane.b32.xlu0 %v929_v17, %s1790_s18  ;;  %v1745_v16 = vpack.c.bf16 %v1134_v15, %v1133_v14  ;;  %v1153_v17 = vld [vmem:[%s2452_s5 + $0x110] sm:$0xff] }
 0x2ba   : > { %1744 = vmatprep.subr.bf16.mxu1 %v1743_v13 }
 0x2bc   : > { %1746 = vmatpush3.bf16.msra.mxu1 %v1745_v16 }
 0x2bd   : > { %1006 = vrot.lane.b32.xlu1 %v940_v18, %s1791_s19  ;;  %966 = vrot.lane.b32.xlu0 %v930_v19, %s1790_s18  ;;  %v1154_v18 = vld [vmem:[%s2452_s5 + $0x118] sm:$0xff] }
 0x2be   : > { %v1751_v19 = vpack.c.bf16 %v1154_v18, %v1153_v17 }
 0x2c0   : > { %1752 = vmatprep.subr.bf16.mxu0 %v1751_v19 }
 0x2c1   : > { %1008 = vrot.lane.b32.xlu1 %v941_v20, %s1791_s19  ;;  %968 = vrot.lane.b32.xlu0 %v931_v30, %s1790_s18 }
 0x2c2   : > { %1754 = vmatpush3.bf16.msra.mxu0 %v1751_v19 }
 0x2c5   : > { %1010 = vrot.lane.b32.xlu1 %v942_v36, %s1791_s19  ;;  %970 = vrot.lane.b32.xlu0 %v932_v40, %s1790_s18 }
 0x2c9   : > { %972 = vrot.lane.b32.xlu0 %v933_v37, %s1790_s18  ;;  %1012 = vrot.lane.b32.xlu1 %v943_v45, %s1791_s19 }
 0x2cd   : > { %994 = vrot.lane.b32.xlu1 %v934_v55, %s1791_s19  ;;  %954 = vrot.lane.b32.xlu0 %v924_v56, %s1790_s18 }
 0x31b   : > { %v959_v20 = vpop.permute.xlu1 %958  ;;  %v957_v21 = vpop.permute.xlu0 %956 }
 0x31c   : > { %v1026_v24 = vsel %vm782_vm7, %v916_v22, %v959_v20  ;;  %v1025_v25 = vsel %vm782_vm7, %v915_v23, %v957_v21 }
 0x31f   : > { %v999_v27 = vpop.permute.xlu1 %998  ;;  %v997_v29 = vpop.permute.xlu0 %996 }
 0x320   : > { %v2268_v30 = vsel %vm1034_vm9, %v1026_v24, %v999_v27  ;;  %v2271_v31 = vsel %vm1034_vm9, %v1025_v25, %v997_v29 }
 0x321   : > { %1078 = vrot.lane.b32.xlu1 %v2268_v30, %s1791_s19  ;;  %1053 = vrot.lane.b32.xlu0 %v2271_v31, %s1792_s22 }
 0x323   : > { %v1001_v0 = vpop.permute.xlu1 %1000  ;;  %v961_v33 = vpop.permute.xlu0 %960 }
 0x324   : > { %v1027_v34 = vsel %vm782_vm7, %v917_v32, %v961_v33 }
 0x325   : > { %1055 = vrot.lane.b32.xlu0 %v2268_v30, %s1792_s22  ;;  %v2281_v35 = vsel %vm1034_vm9, %v1027_v34, %v1001_v0 }
 0x326   : > { %1080 = vrot.lane.b32.xlu1 %v2281_v35, %s1791_s19 }
 0x327   : > { %v1003_v36 = vpop.permute.xlu1 %1002  ;;  %v963_v40 = vpop.permute.xlu0 %962 }
 0x328   : > { %v1028_v41 = vsel %vm782_vm7, %v918_v38, %v963_v40 }
 0x329   : > { %1057 = vrot.lane.b32.xlu0 %v2281_v35, %s1792_s22  ;;  %v2289_v42 = vsel %vm1034_vm9, %v1028_v41, %v1003_v36 }
 0x32a   : > { %1082 = vrot.lane.b32.xlu1 %v2289_v42, %s1791_s19 }
 0x32b   : > { %v1005_v43 = vpop.permute.xlu1 %1004  ;;  %v965_v39 = vpop.permute.xlu0 %964 }
 0x32c   : > { %v1029_v37 = vsel %vm782_vm7, %v919_v26, %v965_v39  ;;  %v2362_v39 = vld [vmem:[%s2453_s6] ss:$0 sm:$0xff] }
 0x32d   : > { %1059 = vrot.lane.b32.xlu0 %v2289_v42, %s1792_s22  ;;  %v2297_v45 = vsel %vm1034_vm9, %v1029_v37, %v1005_v43 }
 0x32e   : > { %1084 = vrot.lane.b32.xlu1 %v2297_v45, %s1791_s19 }
 0x32f   : > { %v1007_v46 = vpop.permute.xlu1 %1006  ;;  %v967_v48 = vpop.permute.xlu0 %966 }
 0x330   : > { %v1030_v49 = vsel %vm782_vm7, %v920_v47, %v967_v48 }
 0x331   : > { %1061 = vrot.lane.b32.xlu0 %v2297_v45, %s1792_s22  ;;  %v2305_v50 = vsel %vm1034_vm9, %v1030_v49, %v1007_v46 }
 0x332   : > { %1086 = vrot.lane.b32.xlu1 %v2305_v50, %s1791_s19 }
 0x333   : > { %v1009_v51 = vpop.permute.xlu1 %1008  ;;  %v969_v53 = vpop.permute.xlu0 %968 }
 0x334   : > { %v1031_v54 = vsel %vm782_vm7, %v921_v52, %v969_v53 }
 0x335   : > { %1063 = vrot.lane.b32.xlu0 %v2305_v50, %s1792_s22  ;;  %v2313_v55 = vsel %vm1034_vm9, %v1031_v54, %v1009_v51 }
 0x336   : > { %1088 = vrot.lane.b32.xlu1 %v2313_v55, %s1791_s19 }
 0x337   : > { %v1011_v56 = vpop.permute.xlu1 %1010  ;;  %v971_v58 = vpop.permute.xlu0 %970 }
 0x338   : > { %v1032_v59 = vsel %vm782_vm7, %v922_v57, %v971_v58 }
 0x339   : > { %1065 = vrot.lane.b32.xlu0 %v2313_v55, %s1792_s22  ;;  %v1043_v60 = vsel %vm1034_vm9, %v1032_v59, %v1011_v56 }
 0x33a   : > { %1090 = vrot.lane.b32.xlu1 %v1043_v60, %s1791_s19 }
 0x33b   : > { %v973_v62 = vpop.permute.xlu0 %972  ;;  %v1013_v63 = vpop.permute.xlu1 %1012 }
 0x33c   : > { %v1033_v1 = vsel %vm782_vm7, %v923_v61, %v973_v62 }
 0x33d   : > { %1067 = vrot.lane.b32.xlu0 %v1043_v60, %s1792_s22  ;;  %v1044_v2 = vsel %vm1034_vm9, %v1033_v1, %v1013_v63 }
 0x33e   : > { %1092 = vrot.lane.b32.xlu1 %v1044_v2, %s1791_s19 }
 0x33f   : > { %v995_v3 = vpop.permute.xlu1 %994  ;;  %v955_v5 = vpop.permute.xlu0 %954 }
 0x340   : > { %v1024_v6 = vsel %vm782_vm7, %v914_v4, %v955_v5 }
 0x341   : > { %v1035_v9 = vsel %vm1034_vm9, %v1024_v6, %v995_v3 }
 0x393   : > { %v1079_v7 = vpop.permute.xlu1 %1078  ;;  %v1054_v8 = vpop.permute.xlu0 %1053 }
 0x394   : > { %1695 = vmatprep.mubr.msk.f32.mxu0 %vm782_vm7, %v1079_v7  ;;  %v1111_v10 = vsel %vm1034_vm9, %v1054_v8, %v1079_v7  ;;  %v1103_v11 = vsel %vm1102_vm10, %v1035_v9, %v1054_v8 }
 0x395   : > { %1242 = vmatprep.mubr.f32.mxu1 %v1111_v10 }
 0x396   : > { %1243 = vmatmul.mubr.f32.vlgmr.msra.gmra.mrb[0].mxu1 %v1103_v11 }
 0x397   : > { %v1056_v12 = vpop.permute.xlu0 %1055 }
 0x398   : > { %v1081_v13 = vpop.permute.xlu1 %1080  ;;  %v1104_v15 = vsel %vm1102_vm10, %v2271_v31, %v1056_v12 }
 0x399   : > { %1696 = vmatmul.mubr.msk.f32.vlgmr.msra.gmra.mrb[8].mxu0 %vm782_vm7, %v1081_v13  ;;  %v1112_v14 = vsel %vm1034_vm9, %v1056_v12, %v1081_v13 }
 0x39a   : > { %1247 = vmatprep.mubr.f32.mxu1 %v1112_v14 }
 0x39b   : > { %1248 = vmatmul.mubr.f32.gmra.mrb[2].mxu1 %v1104_v15  ;;  %v1058_v16 = vpop.permute.xlu0 %1057 }
 0x39c   : > { %v1083_v17 = vpop.permute.xlu1 %1082  ;;  %v1105_v19 = vsel %vm1102_vm10, %v2268_v30, %v1058_v16 }
 0x39d   : > { %1698 = vmatprep.mubr.msk.f32.mxu0 %vm782_vm7, %v1083_v17  ;;  %v1113_v18 = vsel %vm1034_vm9, %v1058_v16, %v1083_v17 }
 0x39e   : > { %1252 = vmatprep.mubr.f32.mxu1 %v1113_v18 }
 0x39f   : > { %1253 = vmatmul.mubr.f32.gmra.mrb[4].mxu1 %v1105_v19  ;;  %v1060_v20 = vpop.permute.xlu0 %1059 }
 0x3a0   : > { %v1085_v21 = vpop.permute.xlu1 %1084  ;;  %v1106_v23 = vsel %vm1102_vm10, %v2281_v35, %v1060_v20 }
 0x3a1   : > { %1699 = vmatmul.mubr.msk.f32.gmra.mrb[10].mxu0 %vm782_vm7, %v1085_v21  ;;  %v1114_v22 = vsel %vm1034_vm9, %v1060_v20, %v1085_v21 }
 0x3a2   : > { %1257 = vmatprep.mubr.f32.mxu1 %v1114_v22 }
 0x3a3   : > { %1258 = vmatmul.mubr.f32.gmra.mrb[6].mxu1 %v1106_v23  ;;  %v1062_v24 = vpop.permute.xlu0 %1061 }
 0x3a4   : > { %v1087_v25 = vpop.permute.xlu1 %1086  ;;  %v1107_v29 = vsel %vm1102_vm10, %v2289_v42, %v1062_v24 }
 0x3a5   : > { %1701 = vmatprep.mubr.msk.f32.mxu0 %vm782_vm7, %v1087_v25  ;;  %v1115_v27 = vsel %vm1034_vm9, %v1062_v24, %v1087_v25 }
 0x3a6   : > { %1262 = vmatprep.mubr.f32.mxu1 %v1115_v27 }
 0x3a7   : > { %1263 = vmatmul.mubr.f32.gmra.mrb[8].mxu1 %v1107_v29  ;;  %v1064_v30 = vpop.permute.xlu0 %1063 }
 0x3a8   : > { %v1089_v31 = vpop.permute.xlu1 %1088  ;;  %v1108_v32 = vsel %vm1102_vm10, %v2297_v45, %v1064_v30 }
 0x3a9   : > { %1702 = vmatmul.mubr.msk.f32.gmra.mrb[12].mxu0 %vm782_vm7, %v1089_v31  ;;  %v1116_v0 = vsel %vm1034_vm9, %v1064_v30, %v1089_v31 }
 0x3aa   : > { %1267 = vmatprep.mubr.f32.mxu1 %v1116_v0 }
 0x3ab   : > { %1268 = vmatmul.mubr.f32.gmra.mrb[10].mxu1 %v1108_v32  ;;  %v1066_v33 = vpop.permute.xlu0 %1065 }
 0x3ac   : > { %v1091_v34 = vpop.permute.xlu1 %1090  ;;  %v1109_v36 = vsel %vm1102_vm10, %v2305_v50, %v1066_v33 }
 0x3ad   : > { %1704 = vmatprep.mubr.msk.f32.mxu0 %vm782_vm7, %v1091_v34  ;;  %v1117_v35 = vsel %vm1034_vm9, %v1066_v33, %v1091_v34 }
 0x3ae   : > { %1272 = vmatprep.mubr.f32.mxu1 %v1117_v35 }
 0x3af   : > { %1273 = vmatmul.mubr.f32.gmra.mrb[12].mxu1 %v1109_v36  ;;  %v1068_v38 = vpop.permute.xlu0 %1067 }
 0x3b0   : > { %v1093_v40 = vpop.permute.xlu1 %1092  ;;  %v1110_v42 = vsel %vm1102_vm10, %v2313_v55, %v1068_v38 }
 0x3b1   : > { %1705 = vmatmul.mubr.msk.f32.gmra.mrb[14].mxu0 %vm782_vm7, %v1093_v40  ;;  %v1118_v41 = vsel %vm1034_vm9, %v1068_v38, %v1093_v40 }
 0x3b2   : > { %1277 = vmatprep.mubr.f32.mxu1 %v1118_v41 }
 0x3b3   : > { %1278 = vmatmul.mubr.f32.gmra.mrb[14].mxu1 %v1110_v42 }
 0x469   : > { %v1629_v43 = vpop.f32.mrb[0].mxu1 }
 0x46a   : > { %v1630_v26 = vpop.f32.mrb[1].mxu1 }
 0x46b   : > { %v1631_v37 = vadd.f32 %v1630_v26, %v1629_v43 }
 0x46c   : > { %v1697_v45 = vpop.f32.mrb[8].mxu0 }
 0x46d   : > { %v1245_v46 = vadd.f32 %v1631_v37, %v2362_v39  ;;  %v1349_v47 = vpop.f32.mrb[9].mxu0 }
 0x46e   : > { %v1632_v48 = vpop.f32.mrb[2].mxu1 }
 0x46f   : > { %v2365_v49 = vadd.f32 %v1349_v47, %v1245_v46  ;;  %v1633_v50 = vpop.f32.mrb[3].mxu1 }
 0x470   : > { %v1634_v51 = vadd.f32 %v1633_v50, %v1632_v48 }
 0x471   : > { %v1409_v55 = vmul.f32 %v2365_v49, %v2365_v49  ;;  %v1388_v60 = vsel %vm782_vm7, %v2365_v49, 0.0 }
 0x472   : > { %v1250_v52 = vadd.f32 %v1634_v51, %v2362_v39  ;;  %v1635_v53 = vpop.f32.mrb[4].mxu1 }
 0x473   : > { %v1636_v54 = vpop.f32.mrb[5].mxu1  ;;  %v1417_v4 = vsel %vm782_vm7, %v1409_v55, 0.0 }
 0x474   : > { %v2370_v56 = vadd.f32 %v1697_v45, %v1250_v52  ;;  %v1637_v57 = vadd.f32 %v1636_v54, %v1635_v53  ;;  %v1700_v58 = vpop.f32.mrb[10].mxu0 }
 0x475   : > { %v1359_v59 = vpop.f32.mrb[11].mxu0 }
 0x476   : > { %v1410_v61 = vmul.f32 %v2370_v56, %v2370_v56  ;;  %v1255_v62 = vadd.f32 %v1637_v57, %v2362_v39  ;;  %v1389_v63 = vsel %vm782_vm7, %v2370_v56, 0.0  ;;  %v1638_v1 = vpop.f32.mrb[6].mxu1 }
 0x477   : > { %v1390_v2 = vadd.f32 %v1389_v63, %v1388_v60  ;;  %v1639_v3 = vpop.f32.mrb[7].mxu1 }
 0x478   : > { %v2380_v5 = vadd.f32 %v1359_v59, %v1255_v62  ;;  %v1418_v6 = vsel %vm782_vm7, %v1410_v61, 0.0  ;;  %v1640_v7 = vadd.f32 %v1639_v3, %v1638_v1 }
 0x479   : > { %v1419_v8 = vadd.f32 %v1418_v6, %v1417_v4 }
 0x47a   : > { %v1391_v9 = vsel %vm782_vm7, %v2380_v5, 0.0  ;;  %v1411_v10 = vmul.f32 %v2380_v5, %v2380_v5  ;;  %v1260_v11 = vadd.f32 %v1640_v7, %v2362_v39  ;;  %v1641_v12 = vpop.f32.mrb[8].mxu1 }
 0x47b   : > { %v1392_v13 = vadd.f32 %v1391_v9, %v1390_v2  ;;  %v1642_v14 = vpop.f32.mrb[9].mxu1 }
 0x47c   : > { %v1420_v15 = vsel %vm782_vm7, %v1411_v10, 0.0  ;;  %v2389_v16 = vadd.f32 %v1700_v58, %v1260_v11  ;;  %v1643_v17 = vadd.f32 %v1642_v14, %v1641_v12  ;;  %v1703_v18 = vpop.f32.mrb[12].mxu0 }
 0x47d   : > { %v1421_v19 = vadd.f32 %v1420_v15, %v1419_v8  ;;  %v1369_v20 = vpop.f32.mrb[13].mxu0 }
 0x47e   : > { %v1412_v21 = vmul.f32 %v2389_v16, %v2389_v16  ;;  %v1265_v22 = vadd.f32 %v1643_v17, %v2362_v39  ;;  %v1393_v23 = vsel %vm782_vm7, %v2389_v16, 0.0  ;;  %v1644_v24 = vpop.f32.mrb[10].mxu1 }
 0x47f   : > { %v1394_v25 = vadd.f32 %v1393_v23, %v1392_v13  ;;  %v1645_v27 = vpop.f32.mrb[11].mxu1 }
 0x480   : > { %v2396_v29 = vadd.f32 %v1369_v20, %v1265_v22  ;;  %v1422_v30 = vsel %vm782_vm7, %v1412_v21, 0.0  ;;  %v1646_v31 = vadd.f32 %v1645_v27, %v1644_v24 }
 0x481   : > { %v1423_v0 = vadd.f32 %v1422_v30, %v1421_v19 }
 0x482   : > { %v1395_v32 = vsel %vm782_vm7, %v2396_v29, 0.0  ;;  %v1413_v33 = vmul.f32 %v2396_v29, %v2396_v29  ;;  %v1270_v34 = vadd.f32 %v1646_v31, %v2362_v39  ;;  %v1647_v35 = vpop.f32.mrb[12].mxu1 }
 0x483   : > { %v1396_v36 = vadd.f32 %v1395_v32, %v1394_v25  ;;  %v1648_v38 = vpop.f32.mrb[13].mxu1 }
 0x484   : > { %v1424_v40 = vsel %vm782_vm7, %v1413_v33, 0.0  ;;  %v2405_v41 = vadd.f32 %v1703_v18, %v1270_v34  ;;  %v1649_v42 = vadd.f32 %v1648_v38, %v1647_v35  ;;  %v1706_v43 = vpop.f32.mrb[14].mxu0 }
 0x485   : > { %v1425_v26 = vadd.f32 %v1424_v40, %v1423_v0  ;;  %v1379_v37 = vpop.f32.mrb[15].mxu0 }
 0x486   : > { %v1414_v45 = vmul.f32 %v2405_v41, %v2405_v41  ;;  %v1275_v46 = vadd.f32 %v1649_v42, %v2362_v39  ;;  %v1397_v47 = vsel %vm782_vm7, %v2405_v41, 0.0  ;;  %v1650_v48 = vpop.f32.mrb[14].mxu1 }
 0x487   : > { %v1398_v50 = vadd.f32 %v1397_v47, %v1396_v36  ;;  %v1651_v51 = vpop.f32.mrb[15].mxu1 }
 0x488   : > { %v1380_v52 = vadd.f32 %v1379_v37, %v1275_v46  ;;  %v1426_v53 = vsel %vm782_vm7, %v1414_v45, 0.0  ;;  %v1652_v54 = vadd.f32 %v1651_v51, %v1650_v48 }
 0x489   : > { %v1427_v55 = vadd.f32 %v1426_v53, %v1425_v26 }
 0x48a   : > { %v1399_v57 = vsel %vm782_vm7, %v1380_v52, 0.0  ;;  %v1415_v58 = vmul.f32 %v1380_v52, %v1380_v52  ;;  %v1280_v59 = vadd.f32 %v1652_v54, %v2362_v39 }
 0x48b   : > { %v1400_v60 = vadd.f32 %v1399_v57, %v1398_v50 }
 0x48c   : > { %v1428_v61 = vsel %vm782_vm7, %v1415_v58, 0.0  ;;  %v1385_v62 = vadd.f32 %v1706_v43, %v1280_v59 }
 0x48d   : > { %v1429_v63 = vadd.f32 %v1428_v61, %v1427_v55 }
 0x48e   : > { %v1401_v1 = vsel %vm782_vm7, %v1385_v62, 0.0  ;;  %v1416_v2 = vmul.f32 %v1385_v62, %v1385_v62 }
 0x48f   : > { %v1402_v3 = vadd.f32 %v1401_v1, %v1400_v60 }
 0x490   : > { %v1430_v4 = vsel %vm782_vm7, %v1416_v2, 0.0 }
 0x491   : > { %v1403_v6 = vrot.slane %v1402_v3, 4  ;;  %v1431_v7 = vadd.f32 %v1430_v4, %v1429_v63 }
 0x493   : > { %v1404_v8 = vadd.f32 %v1403_v6, %v1402_v3  ;;  %v1432_v9 = vrot.slane %v1431_v7, 4 }
 0x495   : > { %v1405_v10 = vrot.slane %v1404_v8, 2  ;;  %v1433_v11 = vadd.f32 %v1432_v9, %v1431_v7 }
 0x497   : > { %v1406_v12 = vadd.f32 %v1405_v10, %v1404_v8  ;;  %v1434_v13 = vrot.slane %v1433_v11, 2 }
 0x499   : > { %v1407_v39 = vrot.slane %v1406_v12, 1  ;;  %v1435_v14 = vadd.f32 %v1434_v13, %v1433_v11 }
 0x49b   : > { %v1408_v15 = vadd.f32 %v1407_v39, %v1406_v12  ;;  %v1436_v17 = vrot.slane %v1435_v14, 1 }
 0x49d   : > { %v1437_v18 = vadd.f32 %v1436_v17, %v1435_v14  ;;  %v1438_v19 = vmul.f32 0.015625, %v1408_v15 }
 0x49f   : > { %v1439_v20 = vmul.f32 0.015625, %v1437_v18  ;;  %v1440_v21 = vmul.f32 %v1438_v19, %v1438_v19  ;;  %v1444_v22 = vsub.f32 %v2365_v49, %v1438_v19  ;;  %v1445_v23 = vsub.f32 %v2370_v56, %v1438_v19  ;;  %v882_v49 = vld [vmem:[%s2454_s7] sm:$0x1] }
 0x4a0   : > { %v1446_v24 = vsub.f32 %v2380_v5, %v1438_v19  ;;  %v1447_v25 = vsub.f32 %v2389_v16, %v1438_v19  ;;  %v1448_v27 = vsub.f32 %v2396_v29, %v1438_v19  ;;  %v1449_v30 = vsub.f32 %v2405_v41, %v1438_v19  ;;  %v1579_v5 = vld [vmem:[%s2455_s8] ss:$0 sm:$0xff] }
 0x4a1   : > { %v1441_v31 = vsub.f32 %v1439_v20, %v1440_v21  ;;  %v1450_v0 = vsub.f32 %v1380_v52, %v1438_v19  ;;  %v1451_v32 = vsub.f32 %v1385_v62, %v1438_v19 }
 0x4a3   : > { %v1442_v33 = vadd.f32 1e-05, %v1441_v31 }
 0x4a5   : > { %1774 = vrsqrt.f32 %v1442_v33 }
 0x4af   : > { %v1775_v34 = vpop.eup %1774 }
 0x4b0   : > { %v1452_v35 = vmul.f32 %v1775_v34, %v882_v49 }
 0x4b2   : > { %v1456_v56 = vrot.slane %v1452_v35, %v850_v28 }
 0x4b4   : > { %v1457_v16 = vmul.f32 %v1456_v56, %v1444_v22  ;;  %v1458_v29 = vmul.f32 %v1456_v56, %v1445_v23  ;;  %v1459_v36 = vmul.f32 %v1456_v56, %v1446_v24  ;;  %v1460_v38 = vmul.f32 %v1456_v56, %v1447_v25 }
 0x4b5   : > { %v1461_v40 = vmul.f32 %v1456_v56, %v1448_v27  ;;  %v1462_v41 = vmul.f32 %v1456_v56, %v1449_v30  ;;  %v1463_v42 = vmul.f32 %v1456_v56, %v1450_v0  ;;  %v1464_v43 = vmul.f32 %v1456_v56, %v1451_v32 }
 0x4b6   : > { %v1471_v26 = vadd.f32 %v1579_v5, %v1457_v16  ;;  %v1472_v37 = vadd.f32 %v1579_v5, %v1458_v29  ;;  %v1473_v45 = vadd.f32 %v1579_v5, %v1459_v36  ;;  %v1474_v46 = vadd.f32 %v1579_v5, %v1460_v38 }
 0x4b7   : > { %v1475_v44 = vadd.f32 %v1579_v5, %v1461_v40  ;;  %v1476_v28 = vadd.f32 %v1579_v5, %v1462_v41  ;;  %v1477_v47 = vadd.f32 %v1579_v5, %v1463_v42  ;;  %v1478_v48 = vadd.f32 %v1579_v5, %v1464_v43 }
 0x4b8   : > { %v1479_v50 = vmax.f32 %v1471_v26, 0.0  ;;  %v1480_v51 = vmax.f32 %v1472_v37, 0.0  ;;  %v1481_v52 = vmax.f32 %v1473_v45, 0.0  ;;  %v1482_v53 = vmax.f32 %v1474_v46, 0.0 }
 0x4b9   : > { %v1483_v54 = vmax.f32 %v1475_v44, 0.0  ;;  %v1484_v55 = vmax.f32 %v1476_v28, 0.0  ;;  %v1485_v57 = vmax.f32 %v1477_v47, 0.0  ;;  %v1486_v58 = vmax.f32 %v1478_v48, 0.0 }
 0x4ba   : > { %1487 = vst.msk [vmem:[%s332_s12] sm:$0xff] %vm782_vm7, %v1479_v50  ;;  %1488 = vst.msk [vmem:[%s332_s12 + $0x8] sm:$0xff] %vm782_vm7, %v1480_v51 }
 0x4bb   : > { %1489 = vst.msk [vmem:[%s332_s12 + $0x10] sm:$0xff] %vm782_vm7, %v1481_v52  ;;  %1490 = vst.msk [vmem:[%s332_s12 + $0x18] sm:$0xff] %vm782_vm7, %v1482_v53 }
 0x4bc   : > { %1491 = vst.msk [vmem:[%s332_s12 + $0x20] sm:$0xff] %vm782_vm7, %v1483_v54  ;;  %1492 = vst.msk [vmem:[%s332_s12 + $0x28] sm:$0xff] %vm782_vm7, %v1484_v55 }
 0x4bd   : > { %1493 = vst.msk [vmem:[%s332_s12 + $0x30] sm:$0xff] %vm782_vm7, %v1485_v57  ;;  %1494 = vst.msk [vmem:[%s332_s12 + $0x38] sm:$0xff] %vm782_vm7, %v1486_v58 }
 0x4be PF: > { %s19_s30 = sadd.s32 1, %s1782_s30  }
 0x4bf   : > { %p16_p4 = scmp.ge.s32.totalorder %s19_s30, 4  }
 0x4c1   :  { %18 = sbr.rel (!%p16_p4) target bundleno = 1 (0x1), region = 88 }

</bundles_post_ra>
